<compile_context>
chip_gen: v7x
topology: tpu7x:2x2x1
jax: 0.10.0
libtpu: 0.0.40
codegen_flags: <defaults>
</compile_context>

<pallas_src>
import functools
import math

import jax
import jax.numpy as jnp
import numpy as np
from jax.experimental import pallas as pl
from jax.experimental.pallas import tpu as pltpu


_VMEM_LIMIT_BYTES = 48 * 1024 * 1024   # explicit scoped-VMEM limit (fits v5e/v6e/v7x)
_ROW_TILE = 256                        # row tile cap; sized for v7x 64 MiB VMEM w/ FFN hidden


def _cparams():
    return pltpu.CompilerParams(
        dimension_semantics=("parallel",),
        vmem_limit_bytes=_VMEM_LIMIT_BYTES,
    )


def _row_tile(m):
    return m if m <= _ROW_TILE else _ROW_TILE


# ---------------------------------------------------------------------------
# shared in-kernel epilogue: ComplexLayerNorm (torch semantics: unbiased var,
# shared real+imag variance, 2x2 gamma mixing, complex beta)
# ---------------------------------------------------------------------------
def _complex_layernorm(tr, ti, grr, gii, gri, br, bi, eps):
    d = tr.shape[-1]
    mr = jnp.mean(tr, axis=-1, keepdims=True)
    mi = jnp.mean(ti, axis=-1, keepdims=True)
    var = (jnp.sum((tr - mr) ** 2, axis=-1, keepdims=True)
           + jnp.sum((ti - mi) ** 2, axis=-1, keepdims=True)) / (d - 1)
    inv = jax.lax.rsqrt(var + eps)          # EUP rsqrt instead of 1/sqrt
    nr = (tr - mr) * inv
    ni = (ti - mi) * inv
    return nr * grr + ni * gri + br, nr * gri + ni * gii + bi


# ---------------------------------------------------------------------------
# Kernel 1: fused complex Q/K/V projection (Gauss 3-matmul complex product)
# ---------------------------------------------------------------------------
def _qkv_kernel(xr_ref, xi_ref, wr_ref, wi_ref, qkvr_ref, qkvi_ref):
    xr, xi = xr_ref[...], xi_ref[...]
    wr, wi = wr_ref[...], wi_ref[...]
    t1 = jnp.dot(xr, wr, preferred_element_type=jnp.float32)
    t2 = jnp.dot(xi, wi, preferred_element_type=jnp.float32)
    t3 = jnp.dot(xr + xi, wr + wi, preferred_element_type=jnp.float32)
    qkvr_ref[...] = t1 - t2            # xr@wr - xi@wi
    qkvi_ref[...] = t3 - t1 - t2       # xr@wi + xi@wr


# ---------------------------------------------------------------------------
# Kernel 2: complex multi-head attention, one batch element per grid step,
#           all heads handled inside via static column slices of the qkv slab.
# ---------------------------------------------------------------------------
def _attention_kernel(qkv_r_ref, qkv_i_ref, or_ref, oi_ref, *, d, num_heads, scale, eps):
    dh = d // num_heads

    def dot_nt(a, b):  # a @ b.T on the MXU (contract the last dims)
        return jax.lax.dot_general(a, b, (((1,), (1,)), ((), ())),
                                   preferred_element_type=jnp.float32)

    # TODO(synk): add flash-style KV tiling (online softmax over |score|) so the
    # S x S temporaries stay bounded for long sequences on v7x's 64 MiB VMEM.
    for h in range(num_heads):
        lo = h * dh
        qr = qkv_r_ref[0, :, lo:lo + dh]
        qi = qkv_i_ref[0, :, lo:lo + dh]
        kr = qkv_r_ref[0, :, d + lo:d + lo + dh]
        ki = qkv_i_ref[0, :, d + lo:d + lo + dh]
        vr = qkv_r_ref[0, :, 2 * d + lo:2 * d + lo + dh]
        vi = qkv_i_ref[0, :, 2 * d + lo:2 * d + lo + dh]

        # scores = complex_bcmm(Q, K^T)/sqrt(dh) == conj(Q) @ K^T, 3-matmul form
        t1 = dot_nt(qr, kr)
        t2 = dot_nt(qi, ki)
        t3 = dot_nt(qr + qi, ki - kr)
        sr = (t1 + t2) * scale
        si = (t3 + t1 - t2) * scale

        # complex_softmax: softmax over |score| along keys, then rescale magnitude.
        # p and change are folded into one factor (one fewer S x S temporary).
        norm = jnp.sqrt(sr * sr + si * si)
        mx = jnp.max(norm, axis=-1, keepdims=True)
        e = jnp.exp(norm - mx)
        row_sum = jnp.sum(e, axis=-1, keepdims=True)
        change = e / (row_sum * (norm + eps))
        ar = sr * change
        ai = si * change

        # complex_bmm(A, V): standard complex product, 3-matmul form
        u1 = jnp.dot(ar, vr, preferred_element_type=jnp.float32)
        u2 = jnp.dot(ai, vi, preferred_element_type=jnp.float32)
        u3 = jnp.dot(ar + ai, vr + vi, preferred_element_type=jnp.float32)
        or_ref[0, :, lo:lo + dh] = u1 - u2
        oi_ref[0, :, lo:lo + dh] = u3 - u1 - u2


# ---------------------------------------------------------------------------
# Kernel 3: output projection + residual + ComplexLayerNorm 1 (fused epilogue)
# ---------------------------------------------------------------------------
def _oproj_addnorm_kernel(ar_ref, ai_ref, xr_ref, xi_ref, wr_ref, wi_ref,
                          grr_ref, gii_ref, gri_ref, br_ref, bi_ref,
                          zr_ref, zi_ref, *, eps):
    ar, ai = ar_ref[...], ai_ref[...]
    wr, wi = wr_ref[...], wi_ref[...]
    t1 = jnp.dot(ar, wr, preferred_element_type=jnp.float32)
    t2 = jnp.dot(ai, wi, preferred_element_type=jnp.float32)
    t3 = jnp.dot(ar + ai, wr + wi, preferred_element_type=jnp.float32)
    yr = t1 - t2
    yi = t3 - t1 - t2
    tr = xr_ref[...] + yr          # residual add (dropout p=0 is identity)
    ti = xi_ref[...] + yi
    zr, zi = _complex_layernorm(tr, ti, grr_ref[...], gii_ref[...], gri_ref[...],
                                br_ref[...], bi_ref[...], eps)
    zr_ref[...] = zr
    zi_ref[...] = zi


# ---------------------------------------------------------------------------
# Kernel 4: position-wise FFN (complex lin -> ComplexSiLU -> complex lin)
#           + residual + ComplexLayerNorm 2 (fused epilogue)
# ---------------------------------------------------------------------------
def _ffn_addnorm_kernel(zr_ref, zi_ref, w1r_ref, w1i_ref, b1r_ref, b1i_ref,
                        w2r_ref, w2i_ref, b2r_ref, b2i_ref,
                        grr_ref, gii_ref, gri_ref, br_ref, bi_ref,
                        or_ref, oi_ref, *, eps):
    zr, zi = zr_ref[...], zi_ref[...]
    w1r, w1i = w1r_ref[...], w1i_ref[...]
    b1r, b1i = b1r_ref[...], b1i_ref[...]
    # complex linear 1 (bias=True, apply_complex semantics):
    #   real = (zr@w1r + b1r) - (zi@w1i + b1i);  imag = (zi@w1r + b1r) + (zr@w1i + b1i)
    t1 = jnp.dot(zr, w1r, preferred_element_type=jnp.float32)
    t2 = jnp.dot(zi, w1i, preferred_element_type=jnp.float32)
    t3 = jnp.dot(zr + zi, w1r + w1i, preferred_element_type=jnp.float32)
    hr = t1 - t2 + (b1r - b1i)
    hi = t3 - t1 - t2 + (b1r + b1i)
    # ComplexSiLU: SiLU applied separately to real and imag parts
    hr = hr * jax.nn.sigmoid(hr)
    hi = hi * jax.nn.sigmoid(hi)
    # complex linear 2 (bias=True)
    w2r, w2i = w2r_ref[...], w2i_ref[...]
    b2r, b2i = b2r_ref[...], b2i_ref[...]
    u1 = jnp.dot(hr, w2r, preferred_element_type=jnp.float32)
    u2 = jnp.dot(hi, w2i, preferred_element_type=jnp.float32)
    u3 = jnp.dot(hr + hi, w2r + w2i, preferred_element_type=jnp.float32)
    fr = u1 - u2 + (b2r - b2i)
    fi = u3 - u1 - u2 + (b2r + b2i)
    # residual add + ComplexLayerNorm 2
    tr = zr + fr
    ti = zi + fi
    outr, outi = _complex_layernorm(tr, ti, grr_ref[...], gii_ref[...], gri_ref[...],
                                    br_ref[...], bi_ref[...], eps)
    or_ref[...] = outr
    oi_ref[...] = outi


# ---------------------------------------------------------------------------
# ComplexEncoderBlock forward
# ---------------------------------------------------------------------------
def complex_encoder_block(x, params, *, num_heads):
    # x: (B, S, D, 2) float32 -- same layout as the PyTorch module.
    b, s, d, _ = x.shape
    m = b * s
    xr = x[..., 0].reshape(m, d)
    xi = x[..., 1].reshape(m, d)

    tm = _row_tile(m)
    n_row = pl.cdiv(m, tm)
    row_spec = pl.BlockSpec((tm, d), lambda i: (i, 0))
    full = lambda shape: pl.BlockSpec(shape, lambda i: (0, 0))
    ln_spec = full((1, d))

    # --- fused Q/K/V complex projection ---
    wqkv_r = jnp.concatenate([params["wq_r"], params["wk_r"], params["wv_r"]], axis=1)
    wqkv_i = jnp.concatenate([params["wq_i"], params["wk_i"], params["wv_i"]], axis=1)
    qkv_r, qkv_i = pl.pallas_call(
        _qkv_kernel,
        grid=(n_row,),
        in_specs=[row_spec, row_spec, full((d, 3 * d)), full((d, 3 * d))],
        out_specs=(pl.BlockSpec((tm, 3 * d), lambda i: (i, 0)),) * 2,
        out_shape=(jax.ShapeDtypeStruct((m, 3 * d), jnp.float32),) * 2,
        compiler_params=_cparams(),
    )(xr, xi, wqkv_r, wqkv_i)

    # --- complex multi-head attention (no host-side head transposes) ---
    dh = d // num_heads
    scale = 1.0 / math.sqrt(dh)      # query_key_dim == head_dim
    qkv_r3 = qkv_r.reshape(b, s, 3 * d)
    qkv_i3 = qkv_i.reshape(b, s, 3 * d)
    attn_in = pl.BlockSpec((1, s, 3 * d), lambda i: (i, 0, 0))
    attn_out = pl.BlockSpec((1, s, d), lambda i: (i, 0, 0))
    ar, ai = pl.pallas_call(
        functools.partial(_attention_kernel, d=d, num_heads=num_heads,
                          scale=scale, eps=1e-9),
        grid=(b,),
        in_specs=[attn_in, attn_in],
        out_specs=(attn_out, attn_out),
        out_shape=(jax.ShapeDtypeStruct((b, s, d), jnp.float32),) * 2,
        compiler_params=_cparams(),
    )(qkv_r3, qkv_i3)
    ar = ar.reshape(m, d)
    ai = ai.reshape(m, d)

    # --- output projection + AddNorm 1 (fused) ---
    zr, zi = pl.pallas_call(
        functools.partial(_oproj_addnorm_kernel, eps=1e-9),
        grid=(n_row,),
        in_specs=[row_spec] * 4 + [full((d, d))] * 2 + [ln_spec] * 5,
        out_specs=(row_spec, row_spec),
        out_shape=(jax.ShapeDtypeStruct((m, d), jnp.float32),) * 2,
        compiler_params=_cparams(),
    )(ar, ai, xr, xi, params["wo_r"], params["wo_i"],
      params["ln1_grr"], params["ln1_gii"], params["ln1_gri"],
      params["ln1_br"], params["ln1_bi"])

    # --- PositionWiseFFN + AddNorm 2 (fused) ---
    h = params["w1_r"].shape[1]
    or_, oi = pl.pallas_call(
        functools.partial(_ffn_addnorm_kernel, eps=1e-9),
        grid=(n_row,),
        in_specs=[row_spec, row_spec,
                  full((d, h)), full((d, h)), full((1, h)), full((1, h)),
                  full((h, d)), full((h, d)), full((1, d)), full((1, d))]
                 + [ln_spec] * 5,
        out_specs=(row_spec, row_spec),
        out_shape=(jax.ShapeDtypeStruct((m, d), jnp.float32),) * 2,
        compiler_params=_cparams(),
    )(zr, zi,
      params["w1_r"], params["w1_i"], params["b1_r"], params["b1_i"],
      params["w2_r"], params["w2_i"], params["b2_r"], params["b2_i"],
      params["ln2_grr"], params["ln2_gii"], params["ln2_gri"],
      params["ln2_br"], params["ln2_bi"])

    return jnp.stack((or_.reshape(b, s, d), oi.reshape(b, s, d)), axis=-1)


# ---------------------------------------------------------------------------
# Pure-JAX reference (mirrors the PyTorch math) for correctness checking
# ---------------------------------------------------------------------------
_HP = jax.lax.Precision.HIGHEST


def _ref_clinear(xr, xi, wr, wi, br=None, bi=None):
    fr_r = jnp.dot(xr, wr, precision=_HP)
    fi_i = jnp.dot(xi, wi, precision=_HP)
    fr_i = jnp.dot(xi, wr, precision=_HP)
    fi_r = jnp.dot(xr, wi, precision=_HP)
    if br is not None:
        fr_r = fr_r + br
        fi_i = fi_i + bi
        fr_i = fr_i + br
        fi_r = fi_r + bi
    return fr_r - fi_i, fr_i + fi_r


def _ref_addnorm(xr, xi, yr, yi, grr, gii, gri, br, bi, eps=1e-9):
    tr, ti = xr + yr, xi + yi
    d = tr.shape[-1]
    mr = jnp.mean(tr, axis=-1, keepdims=True)
    mi = jnp.mean(ti, axis=-1, keepdims=True)
    var = (jnp.sum((tr - mr) ** 2, axis=-1, keepdims=True)
           + jnp.sum((ti - mi) ** 2, axis=-1, keepdims=True)) / (d - 1)
    inv = 1.0 / jnp.sqrt(var + eps)
    nr, ni = (tr - mr) * inv, (ti - mi) * inv
    return nr * grr + ni * gri + br, nr * gri + ni * gii + bi


def _ref_attention(qr, qi, kr, ki, vr, vi, scale, eps=1e-9):
    sr = (jnp.einsum("bqd,bkd->bqk", qr, kr, precision=_HP)
          + jnp.einsum("bqd,bkd->bqk", qi, ki, precision=_HP)) * scale
    si = (jnp.einsum("bqd,bkd->bqk", qr, ki, precision=_HP)
          - jnp.einsum("bqd,bkd->bqk", qi, kr, precision=_HP)) * scale
    norm = jnp.sqrt(sr * sr + si * si)
    p = jax.nn.softmax(norm, axis=-1)
    change = p / (norm + eps)
    ar, ai = sr * change, si * change
    out_r = (jnp.einsum("bqk,bkd->bqd", ar, vr, precision=_HP)
             - jnp.einsum("bqk,bkd->bqd", ai, vi, precision=_HP))
    out_i = (jnp.einsum("bqk,bkd->bqd", ar, vi, precision=_HP)
             + jnp.einsum("bqk,bkd->bqd", ai, vr, precision=_HP))
    return out_r, out_i


def reference_forward(x, params, *, num_heads):
    b, s, d, _ = x.shape
    xr = x[..., 0].reshape(b * s, d)
    xi = x[..., 1].reshape(b * s, d)
    qr, qi = _ref_clinear(xr, xi, params["wq_r"], params["wq_i"])
    kr, ki = _ref_clinear(xr, xi, params["wk_r"], params["wk_i"])
    vr, vi = _ref_clinear(xr, xi, params["wv_r"], params["wv_i"])
    dh = d // num_heads
    sh = lambda t: t.reshape(b, s, num_heads, dh).transpose(0, 2, 1, 3).reshape(b * num_heads, s, dh)
    qr, qi, kr, ki, vr, vi = map(sh, (qr, qi, kr, ki, vr, vi))
    ar, ai = _ref_attention(qr, qi, kr, ki, vr, vi, 1.0 / math.sqrt(dh))
    mh = lambda t: t.reshape(b, num_heads, s, dh).transpose(0, 2, 1, 3).reshape(b * s, d)
    ar, ai = mh(ar), mh(ai)
    yr, yi = _ref_clinear(ar, ai, params["wo_r"], params["wo_i"])
    zr, zi = _ref_addnorm(xr, xi, yr, yi,
                          params["ln1_grr"], params["ln1_gii"], params["ln1_gri"],
                          params["ln1_br"], params["ln1_bi"])
    h1r, h1i = _ref_clinear(zr, zi, params["w1_r"], params["w1_i"],
                            params["b1_r"], params["b1_i"])
    h1r, h1i = jax.nn.silu(h1r), jax.nn.silu(h1i)
    fr, fi = _ref_clinear(h1r, h1i, params["w2_r"], params["w2_i"],
                          params["b2_r"], params["b2_i"])
    or_, oi = _ref_addnorm(zr, zi, fr, fi,
                           params["ln2_grr"], params["ln2_gii"], params["ln2_gri"],
                           params["ln2_br"], params["ln2_bi"])
    return jnp.stack((or_.reshape(b, s, d), oi.reshape(b, s, d)), axis=-1)


# ---------------------------------------------------------------------------
# Deterministic parameter init (shapes from the module's __init__)
# ---------------------------------------------------------------------------
def init_params(key, d, ffn_hidden):
    ks = jax.random.split(key, 12)
    p = {}
    for i, name in enumerate(("wq", "wk", "wv", "wo")):
        p[name + "_r"] = 0.1 * jax.random.normal(ks[2 * i], (d, d), jnp.float32)
        p[name + "_i"] = 0.1 * jax.random.normal(ks[2 * i + 1], (d, d), jnp.float32)
    p["w1_r"] = 0.1 * jax.random.normal(ks[8], (d, ffn_hidden), jnp.float32)
    p["w1_i"] = 0.1 * jax.random.normal(ks[9], (d, ffn_hidden), jnp.float32)
    p["w2_r"] = 0.1 * jax.random.normal(ks[10], (ffn_hidden, d), jnp.float32)
    p["w2_i"] = 0.1 * jax.random.normal(ks[11], (ffn_hidden, d), jnp.float32)
    # FFN ComplexLinear biases (bias=True); deterministic small values
    p["b1_r"] = jnp.full((1, ffn_hidden), 0.01, jnp.float32)
    p["b1_i"] = jnp.full((1, ffn_hidden), -0.02, jnp.float32)
    p["b2_r"] = jnp.full((1, d), 0.03, jnp.float32)
    p["b2_i"] = jnp.full((1, d), 0.01, jnp.float32)
    # ComplexLayerNorm params exactly as in the module __init__
    for ln in ("ln1", "ln2"):
        p[ln + "_grr"] = jnp.full((1, d), 1.0 / math.sqrt(2.0), jnp.float32)
        p[ln + "_gii"] = jnp.full((1, d), 1.0 / math.sqrt(2.0), jnp.float32)
        p[ln + "_gri"] = jnp.zeros((1, d), jnp.float32)
        p[ln + "_br"] = jnp.zeros((1, d), jnp.float32)
        p[ln + "_bi"] = jnp.zeros((1, d), jnp.float32)
    return p


if __name__ == "__main__":
    B, S, D, NUM_HEADS, FFN_HIDDEN = 2, 8, 32, 4, 32  # ffn_hidden == D (residual)

    key = jax.random.PRNGKey(0)
    k_x, k_p = jax.random.split(key)
    x = jax.random.normal(k_x, (B, S, D, 2), jnp.float32)
    params = init_params(k_p, D, FFN_HIDDEN)

    fwd = jax.jit(functools.partial(complex_encoder_block, num_heads=NUM_HEADS))
    out = jax.block_until_ready(fwd(x, params))

    ref = reference_forward(x, params, num_heads=NUM_HEADS)
    np.testing.assert_allclose(np.asarray(out), np.asarray(ref), rtol=5e-3, atol=5e-3)
    assert out.shape == (B, S, D, 2)

    print("KERNEL_OK")
</pallas_src>

<mosaic_0001>
module attributes {stable_mosaic.version = 11 : i64} {
  func.func @_qkv_kernel(%arg0: i32, %arg1: memref<16x32xf32, #tpu.memory_space<vmem>>, %arg2: memref<16x32xf32, #tpu.memory_space<vmem>>, %arg3: memref<32x96xf32, #tpu.memory_space<vmem>>, %arg4: memref<32x96xf32, #tpu.memory_space<vmem>>, %arg5: memref<16x96xf32, #tpu.memory_space<vmem>>, %arg6: memref<16x96xf32, #tpu.memory_space<vmem>>) attributes {dimension_semantics = [#tpu.dimension_semantics<parallel>], iteration_bounds = array<i64: 1>, scalar_prefetch = 0 : i64, scratch_operands = 0 : i64, tpu.core_type = #tpu.core_type<tc>, window_params = [{transform_indices = @transform_0, window_bounds = array<i64: 16, 32>}, {transform_indices = @transform_1, window_bounds = array<i64: 16, 32>}, {pipeline_mode = #tpu.pipeline_mode<synchronous>, transform_indices = @transform_2, window_bounds = array<i64: 32, 96>}, {pipeline_mode = #tpu.pipeline_mode<synchronous>, transform_indices = @transform_3, window_bounds = array<i64: 32, 96>}, {transform_indices = @transform_4, window_bounds = array<i64: 16, 96>}, {transform_indices = @transform_5, window_bounds = array<i64: 16, 96>}]} {
    %c0 = arith.constant 0 : index
    %c0_0 = arith.constant 0 : index
    %0 = vector.load %arg1[%c0, %c0_0] : memref<16x32xf32, #tpu.memory_space<vmem>>, vector<16x32xf32>
    %c0_1 = arith.constant 0 : index
    %c0_2 = arith.constant 0 : index
    %1 = vector.load %arg2[%c0_1, %c0_2] : memref<16x32xf32, #tpu.memory_space<vmem>>, vector<16x32xf32>
    %c0_3 = arith.constant 0 : index
    %c0_4 = arith.constant 0 : index
    %2 = vector.load %arg3[%c0_3, %c0_4] : memref<32x96xf32, #tpu.memory_space<vmem>>, vector<32x96xf32>
    %c0_5 = arith.constant 0 : index
    %c0_6 = arith.constant 0 : index
    %3 = vector.load %arg4[%c0_5, %c0_6] : memref<32x96xf32, #tpu.memory_space<vmem>>, vector<32x96xf32>
    %cst = arith.constant dense<0.000000e+00> : vector<16x96xf32>
    %4 = tpu.matmul %0, %2, %cst {dimension_numbers = #tpu.dot_dimension_numbers<[1], [0], [0], [1], [0, 0, 1, 1], [], []>} : vector<16x32xf32>, vector<32x96xf32>, vector<16x96xf32> -> vector<16x96xf32>
    %cst_7 = arith.constant dense<0.000000e+00> : vector<16x96xf32>
    %5 = tpu.matmul %1, %3, %cst_7 {dimension_numbers = #tpu.dot_dimension_numbers<[1], [0], [0], [1], [0, 0, 1, 1], [], []>} : vector<16x32xf32>, vector<32x96xf32>, vector<16x96xf32> -> vector<16x96xf32>
    %6 = arith.addf %0, %1 : vector<16x32xf32>
    %7 = arith.addf %2, %3 : vector<32x96xf32>
    %cst_8 = arith.constant dense<0.000000e+00> : vector<16x96xf32>
    %8 = tpu.matmul %6, %7, %cst_8 {dimension_numbers = #tpu.dot_dimension_numbers<[1], [0], [0], [1], [0, 0, 1, 1], [], []>} : vector<16x32xf32>, vector<32x96xf32>, vector<16x96xf32> -> vector<16x96xf32>
    %9 = arith.subf %4, %5 : vector<16x96xf32>
    %c0_9 = arith.constant 0 : index
    %c0_10 = arith.constant 0 : index
    %10 = vector.load %arg5[%c0_9, %c0_10] : memref<16x96xf32, #tpu.memory_space<vmem>>, vector<16x96xf32>
    tpu.vector_store %arg5[%c0_9, %c0_10], %9 {strides = array<i32>} : memref<16x96xf32, #tpu.memory_space<vmem>>, vector<16x96xf32>,
    %11 = arith.subf %8, %4 : vector<16x96xf32>
    %12 = arith.subf %11, %5 : vector<16x96xf32>
    %c0_11 = arith.constant 0 : index
    %c0_12 = arith.constant 0 : index
    %13 = vector.load %arg6[%c0_11, %c0_12] : memref<16x96xf32, #tpu.memory_space<vmem>>, vector<16x96xf32>
    tpu.vector_store %arg6[%c0_11, %c0_12], %12 {strides = array<i32>} : memref<16x96xf32, #tpu.memory_space<vmem>>, vector<16x96xf32>,
    return
  }
  func.func @transform_0(%arg0: i32) -> (i32, i32) {
    %c0_i32 = arith.constant 0 : i32
    %c0_i32_0 = arith.constant 0 : i32
    return %arg0, %c0_i32 : i32, i32
  }
  func.func @transform_1(%arg0: i32) -> (i32, i32) {
    %c0_i32 = arith.constant 0 : i32
    %c0_i32_0 = arith.constant 0 : i32
    return %arg0, %c0_i32 : i32, i32
  }
  func.func @transform_2(%arg0: i32) -> (i32, i32) {
    %c0_i32 = arith.constant 0 : i32
    %c0_i32_0 = arith.constant 0 : i32
    %c0_i32_1 = arith.constant 0 : i32
    return %c0_i32, %c0_i32_0 : i32, i32
  }
  func.func @transform_3(%arg0: i32) -> (i32, i32) {
    %c0_i32 = arith.constant 0 : i32
    %c0_i32_0 = arith.constant 0 : i32
    %c0_i32_1 = arith.constant 0 : i32
    return %c0_i32, %c0_i32_0 : i32, i32
  }
  func.func @transform_4(%arg0: i32) -> (i32, i32) {
    %c0_i32 = arith.constant 0 : i32
    %c0_i32_0 = arith.constant 0 : i32
    return %arg0, %c0_i32 : i32, i32
  }
  func.func @transform_5(%arg0: i32) -> (i32, i32) {
    %c0_i32 = arith.constant 0 : i32
    %c0_i32_0 = arith.constant 0 : i32
    return %arg0, %c0_i32 : i32, i32
  }
}

module attributes {stable_mosaic.version = 11 : i64} {
  func.func @_attention_kernel(%arg0: i32, %arg1: memref<1x8x96xf32, #tpu.memory_space<vmem>>, %arg2: memref<1x8x96xf32, #tpu.memory_space<vmem>>, %arg3: memref<1x8x32xf32, #tpu.memory_space<vmem>>, %arg4: memref<1x8x32xf32, #tpu.memory_space<vmem>>) attributes {dimension_semantics = [#tpu.dimension_semantics<parallel>], iteration_bounds = array<i64: 2>, scalar_prefetch = 0 : i64, scratch_operands = 0 : i64, tpu.core_type = #tpu.core_type<tc>, window_params = [{transform_indices = @transform_0, window_bounds = array<i64: 1, 8, 96>}, {transform_indices = @transform_1, window_bounds = array<i64: 1, 8, 96>}, {transform_indices = @transform_2, window_bounds = array<i64: 1, 8, 32>}, {transform_indices = @transform_3, window_bounds = array<i64: 1, 8, 32>}]} {
    %c0 = arith.constant 0 : index
    %c0_0 = arith.constant 0 : index
    %c0_1 = arith.constant 0 : index
    %0 = vector.load %arg1[%c0, %c0_0, %c0_1] : memref<1x8x96xf32, #tpu.memory_space<vmem>>, vector<1x8x8xf32>
    %1 = vector.shape_cast %0 : vector<1x8x8xf32> to vector<8x8xf32>
    %c0_2 = arith.constant 0 : index
    %c0_3 = arith.constant 0 : index
    %c0_4 = arith.constant 0 : index
    %2 = vector.load %arg2[%c0_2, %c0_3, %c0_4] : memref<1x8x96xf32, #tpu.memory_space<vmem>>, vector<1x8x8xf32>
    %3 = vector.shape_cast %2 : vector<1x8x8xf32> to vector<8x8xf32>
    %c0_5 = arith.constant 0 : index
    %c0_6 = arith.constant 0 : index
    %c32 = arith.constant 32 : index
    %4 = vector.load %arg1[%c0_5, %c0_6, %c32] : memref<1x8x96xf32, #tpu.memory_space<vmem>>, vector<1x8x8xf32>
    %5 = vector.shape_cast %4 : vector<1x8x8xf32> to vector<8x8xf32>
    %c0_7 = arith.constant 0 : index
    %c0_8 = arith.constant 0 : index
    %c32_9 = arith.constant 32 : index
    %6 = vector.load %arg2[%c0_7, %c0_8, %c32_9] : memref<1x8x96xf32, #tpu.memory_space<vmem>>, vector<1x8x8xf32>
    %7 = vector.shape_cast %6 : vector<1x8x8xf32> to vector<8x8xf32>
    %c0_10 = arith.constant 0 : index
    %c0_11 = arith.constant 0 : index
    %c64 = arith.constant 64 : index
    %8 = vector.load %arg1[%c0_10, %c0_11, %c64] : memref<1x8x96xf32, #tpu.memory_space<vmem>>, vector<1x8x8xf32>
    %9 = vector.shape_cast %8 : vector<1x8x8xf32> to vector<8x8xf32>
    %c0_12 = arith.constant 0 : index
    %c0_13 = arith.constant 0 : index
    %c64_14 = arith.constant 64 : index
    %10 = vector.load %arg2[%c0_12, %c0_13, %c64_14] : memref<1x8x96xf32, #tpu.memory_space<vmem>>, vector<1x8x8xf32>
    %11 = vector.shape_cast %10 : vector<1x8x8xf32> to vector<8x8xf32>
    %cst = arith.constant dense<0.000000e+00> : vector<8x8xf32>
    %12 = tpu.matmul %1, %5, %cst {dimension_numbers = #tpu.dot_dimension_numbers<[1], [1], [0], [0], [0, 0, 1, 0], [], []>} : vector<8x8xf32>, vector<8x8xf32>, vector<8x8xf32> -> vector<8x8xf32>
    %cst_15 = arith.constant dense<0.000000e+00> : vector<8x8xf32>
    %13 = tpu.matmul %3, %7, %cst_15 {dimension_numbers = #tpu.dot_dimension_numbers<[1], [1], [0], [0], [0, 0, 1, 0], [], []>} : vector<8x8xf32>, vector<8x8xf32>, vector<8x8xf32> -> vector<8x8xf32>
    %14 = arith.addf %1, %3 : vector<8x8xf32>
    %15 = arith.subf %7, %5 : vector<8x8xf32>
    %cst_16 = arith.constant dense<0.000000e+00> : vector<8x8xf32>
    %16 = tpu.matmul %14, %15, %cst_16 {dimension_numbers = #tpu.dot_dimension_numbers<[1], [1], [0], [0], [0, 0, 1, 0], [], []>} : vector<8x8xf32>, vector<8x8xf32>, vector<8x8xf32> -> vector<8x8xf32>
    %17 = arith.addf %12, %13 : vector<8x8xf32>
    %cst_17 = arith.constant 0.353553385 : f32
    %18 = vector.broadcast %cst_17 : f32 to vector<8x8xf32>
    %19 = arith.mulf %17, %18 : vector<8x8xf32>
    %20 = arith.addf %16, %12 : vector<8x8xf32>
    %21 = arith.subf %20, %13 : vector<8x8xf32>
    %cst_18 = arith.constant 0.353553385 : f32
    %22 = vector.broadcast %cst_18 : f32 to vector<8x8xf32>
    %23 = arith.mulf %21, %22 : vector<8x8xf32>
    %24 = arith.mulf %19, %19 : vector<8x8xf32>
    %25 = arith.mulf %23, %23 : vector<8x8xf32>
    %26 = arith.addf %24, %25 : vector<8x8xf32>
    %27 = math.sqrt %26 : vector<8x8xf32>
    %cst_19 = arith.constant dense<0xFF800000> : vector<8xf32>
    %28 = vector.multi_reduction <maximumf>, %27, %cst_19 [1] : vector<8x8xf32> to vector<8xf32>
    %29 = vector.shape_cast %28 : vector<8xf32> to vector<8x1xf32>
    %30 = vector.broadcast %29 : vector<8x1xf32> to vector<8x8xf32>
    %31 = arith.subf %27, %30 : vector<8x8xf32>
    %32 = math.exp %31 : vector<8x8xf32>
    %cst_20 = arith.constant dense<0.000000e+00> : vector<8xf32>
    %33 = vector.multi_reduction <add>, %32, %cst_20 [1] : vector<8x8xf32> to vector<8xf32>
    %34 = vector.shape_cast %33 : vector<8xf32> to vector<8x1xf32>
    %cst_21 = arith.constant 9.99999971E-10 : f32
    %35 = vector.broadcast %cst_21 : f32 to vector<8x8xf32>
    %36 = arith.addf %27, %35 : vector<8x8xf32>
    %37 = vector.broadcast %34 : vector<8x1xf32> to vector<8x8xf32>
    %38 = arith.mulf %37, %36 : vector<8x8xf32>
    %39 = arith.divf %32, %38 : vector<8x8xf32>
    %40 = arith.mulf %19, %39 : vector<8x8xf32>
    %41 = arith.mulf %23, %39 : vector<8x8xf32>
    %cst_22 = arith.constant dense<0.000000e+00> : vector<8x8xf32>
    %42 = tpu.matmul %40, %9, %cst_22 {dimension_numbers = #tpu.dot_dimension_numbers<[1], [0], [0], [1], [0, 0, 1, 1], [], []>} : vector<8x8xf32>, vector<8x8xf32>, vector<8x8xf32> -> vector<8x8xf32>
    %cst_23 = arith.constant dense<0.000000e+00> : vector<8x8xf32>
    %43 = tpu.matmul %41, %11, %cst_23 {dimension_numbers = #tpu.dot_dimension_numbers<[1], [0], [0], [1], [0, 0, 1, 1], [], []>} : vector<8x8xf32>, vector<8x8xf32>, vector<8x8xf32> -> vector<8x8xf32>
    %44 = arith.addf %40, %41 : vector<8x8xf32>
    %45 = arith.addf %9, %11 : vector<8x8xf32>
    %cst_24 = arith.constant dense<0.000000e+00> : vector<8x8xf32>
    %46 = tpu.matmul %44, %45, %cst_24 {dimension_numbers = #tpu.dot_dimension_numbers<[1], [0], [0], [1], [0, 0, 1, 1], [], []>} : vector<8x8xf32>, vector<8x8xf32>, vector<8x8xf32> -> vector<8x8xf32>
    %47 = arith.subf %42, %43 : vector<8x8xf32>
    %c0_25 = arith.constant 0 : index
    %c0_26 = arith.constant 0 : index
    %c0_27 = arith.constant 0 : index
    %48 = vector.load %arg3[%c0_25, %c0_26, %c0_27] : memref<1x8x32xf32, #tpu.memory_space<vmem>>, vector<1x8x8xf32>
    %49 = vector.shape_cast %48 : vector<1x8x8xf32> to vector<8x8xf32>
    %50 = vector.shape_cast %47 : vector<8x8xf32> to vector<1x8x8xf32>
    tpu.vector_store %arg3[%c0_25, %c0_26, %c0_27], %50 {strides = array<i32>} : memref<1x8x32xf32, #tpu.memory_space<vmem>>, vector<1x8x8xf32>,
    %51 = arith.subf %46, %42 : vector<8x8xf32>
    %52 = arith.subf %51, %43 : vector<8x8xf32>
    %c0_28 = arith.constant 0 : index
    %c0_29 = arith.constant 0 : index
    %c0_30 = arith.constant 0 : index
    %53 = vector.load %arg4[%c0_28, %c0_29, %c0_30] : memref<1x8x32xf32, #tpu.memory_space<vmem>>, vector<1x8x8xf32>
    %54 = vector.shape_cast %53 : vector<1x8x8xf32> to vector<8x8xf32>
    %55 = vector.shape_cast %52 : vector<8x8xf32> to vector<1x8x8xf32>
    tpu.vector_store %arg4[%c0_28, %c0_29, %c0_30], %55 {strides = array<i32>} : memref<1x8x32xf32, #tpu.memory_space<vmem>>, vector<1x8x8xf32>,
    %c0_31 = arith.constant 0 : index
    %c0_32 = arith.constant 0 : index
    %c8 = arith.constant 8 : index
    %56 = vector.load %arg1[%c0_31, %c0_32, %c8] : memref<1x8x96xf32, #tpu.memory_space<vmem>>, vector<1x8x8xf32>
    %57 = vector.shape_cast %56 : vector<1x8x8xf32> to vector<8x8xf32>
    %c0_33 = arith.constant 0 : index
    %c0_34 = arith.constant 0 : index
    %c8_35 = arith.constant 8 : index
    %58 = vector.load %arg2[%c0_33, %c0_34, %c8_35] : memref<1x8x96xf32, #tpu.memory_space<vmem>>, vector<1x8x8xf32>
    %59 = vector.shape_cast %58 : vector<1x8x8xf32> to vector<8x8xf32>
    %c0_36 = arith.constant 0 : index
    %c0_37 = arith.constant 0 : index
    %c40 = arith.constant 40 : index
    %60 = vector.load %arg1[%c0_36, %c0_37, %c40] : memref<1x8x96xf32, #tpu.memory_space<vmem>>, vector<1x8x8xf32>
    %61 = vector.shape_cast %60 : vector<1x8x8xf32> to vector<8x8xf32>
    %c0_38 = arith.constant 0 : index
    %c0_39 = arith.constant 0 : index
    %c40_40 = arith.constant 40 : index
    %62 = vector.load %arg2[%c0_38, %c0_39, %c40_40] : memref<1x8x96xf32, #tpu.memory_space<vmem>>, vector<1x8x8xf32>
    %63 = vector.shape_cast %62 : vector<1x8x8xf32> to vector<8x8xf32>
    %c0_41 = arith.constant 0 : index
    %c0_42 = arith.constant 0 : index
    %c72 = arith.constant 72 : index
    %64 = vector.load %arg1[%c0_41, %c0_42, %c72] : memref<1x8x96xf32, #tpu.memory_space<vmem>>, vector<1x8x8xf32>
    %65 = vector.shape_cast %64 : vector<1x8x8xf32> to vector<8x8xf32>
    %c0_43 = arith.constant 0 : index
    %c0_44 = arith.constant 0 : index
    %c72_45 = arith.constant 72 : index
    %66 = vector.load %arg2[%c0_43, %c0_44, %c72_45] : memref<1x8x96xf32, #tpu.memory_space<vmem>>, vector<1x8x8xf32>
    %67 = vector.shape_cast %66 : vector<1x8x8xf32> to vector<8x8xf32>
    %cst_46 = arith.constant dense<0.000000e+00> : vector<8x8xf32>
    %68 = tpu.matmul %57, %61, %cst_46 {dimension_numbers = #tpu.dot_dimension_numbers<[1], [1], [0], [0], [0, 0, 1, 0], [], []>} : vector<8x8xf32>, vector<8x8xf32>, vector<8x8xf32> -> vector<8x8xf32>
    %cst_47 = arith.constant dense<0.000000e+00> : vector<8x8xf32>
    %69 = tpu.matmul %59, %63, %cst_47 {dimension_numbers = #tpu.dot_dimension_numbers<[1], [1], [0], [0], [0, 0, 1, 0], [], []>} : vector<8x8xf32>, vector<8x8xf32>, vector<8x8xf32> -> vector<8x8xf32>
    %70 = arith.addf %57, %59 : vector<8x8xf32>
    %71 = arith.subf %63, %61 : vector<8x8xf32>
    %cst_48 = arith.constant dense<0.000000e+00> : vector<8x8xf32>
    %72 = tpu.matmul %70, %71, %cst_48 {dimension_numbers = #tpu.dot_dimension_numbers<[1], [1], [0], [0], [0, 0, 1, 0], [], []>} : vector<8x8xf32>, vector<8x8xf32>, vector<8x8xf32> -> vector<8x8xf32>
    %73 = arith.addf %68, %69 : vector<8x8xf32>
    %cst_49 = arith.constant 0.353553385 : f32
    %74 = vector.broadcast %cst_49 : f32 to vector<8x8xf32>
    %75 = arith.mulf %73, %74 : vector<8x8xf32>
    %76 = arith.addf %72, %68 : vector<8x8xf32>
    %77 = arith.subf %76, %69 : vector<8x8xf32>
    %cst_50 = arith.constant 0.353553385 : f32
    %78 = vector.broadcast %cst_50 : f32 to vector<8x8xf32>
    %79 = arith.mulf %77, %78 : vector<8x8xf32>
    %80 = arith.mulf %75, %75 : vector<8x8xf32>
    %81 = arith.mulf %79, %79 : vector<8x8xf32>
    %82 = arith.addf %80, %81 : vector<8x8xf32>
    %83 = math.sqrt %82 : vector<8x8xf32>
    %cst_51 = arith.constant dense<0xFF800000> : vector<8xf32>
    %84 = vector.multi_reduction <maximumf>, %83, %cst_51 [1] : vector<8x8xf32> to vector<8xf32>
    %85 = vector.shape_cast %84 : vector<8xf32> to vector<8x1xf32>
    %86 = vector.broadcast %85 : vector<8x1xf32> to vector<8x8xf32>
    %87 = arith.subf %83, %86 : vector<8x8xf32>
    %88 = math.exp %87 : vector<8x8xf32>
    %cst_52 = arith.constant dense<0.000000e+00> : vector<8xf32>
    %89 = vector.multi_reduction <add>, %88, %cst_52 [1] : vector<8x8xf32> to vector<8xf32>
    %90 = vector.shape_cast %89 : vector<8xf32> to vector<8x1xf32>
    %cst_53 = arith.constant 9.99999971E-10 : f32
    %91 = vector.broadcast %cst_53 : f32 to vector<8x8xf32>
    %92 = arith.addf %83, %91 : vector<8x8xf32>
    %93 = vector.broadcast %90 : vector<8x1xf32> to vector<8x8xf32>
    %94 = arith.mulf %93, %92 : vector<8x8xf32>
    %95 = arith.divf %88, %94 : vector<8x8xf32>
    %96 = arith.mulf %75, %95 : vector<8x8xf32>
    %97 = arith.mulf %79, %95 : vector<8x8xf32>
    %cst_54 = arith.constant dense<0.000000e+00> : vector<8x8xf32>
    %98 = tpu.matmul %96, %65, %cst_54 {dimension_numbers = #tpu.dot_dimension_numbers<[1], [0], [0], [1], [0, 0, 1, 1], [], []>} : vector<8x8xf32>, vector<8x8xf32>, vector<8x8xf32> -> vector<8x8xf32>
    %cst_55 = arith.constant dense<0.000000e+00> : vector<8x8xf32>
    %99 = tpu.matmul %97, %67, %cst_55 {dimension_numbers = #tpu.dot_dimension_numbers<[1], [0], [0], [1], [0, 0, 1, 1], [], []>} : vector<8x8xf32>, vector<8x8xf32>, vector<8x8xf32> -> vector<8x8xf32>
    %100 = arith.addf %96, %97 : vector<8x8xf32>
    %101 = arith.addf %65, %67 : vector<8x8xf32>
    %cst_56 = arith.constant dense<0.000000e+00> : vector<8x8xf32>
    %102 = tpu.matmul %100, %101, %cst_56 {dimension_numbers = #tpu.dot_dimension_numbers<[1], [0], [0], [1], [0, 0, 1, 1], [], []>} : vector<8x8xf32>, vector<8x8xf32>, vector<8x8xf32> -> vector<8x8xf32>
    %103 = arith.subf %98, %99 : vector<8x8xf32>
    %c0_57 = arith.constant 0 : index
    %c0_58 = arith.constant 0 : index
    %c8_59 = arith.constant 8 : index
    %104 = vector.load %arg3[%c0_57, %c0_58, %c8_59] : memref<1x8x32xf32, #tpu.memory_space<vmem>>, vector<1x8x8xf32>
    %105 = vector.shape_cast %104 : vector<1x8x8xf32> to vector<8x8xf32>
    %106 = vector.shape_cast %103 : vector<8x8xf32> to vector<1x8x8xf32>
    tpu.vector_store %arg3[%c0_57, %c0_58, %c8_59], %106 {strides = array<i32>} : memref<1x8x32xf32, #tpu.memory_space<vmem>>, vector<1x8x8xf32>,
    %107 = arith.subf %102, %98 : vector<8x8xf32>
    %108 = arith.subf %107, %99 : vector<8x8xf32>
    %c0_60 = arith.constant 0 : index
    %c0_61 = arith.constant 0 : index
    %c8_62 = arith.constant 8 : index
    %109 = vector.load %arg4[%c0_60, %c0_61, %c8_62] : memref<1x8x32xf32, #tpu.memory_space<vmem>>, vector<1x8x8xf32>
    %110 = vector.shape_cast %109 : vector<1x8x8xf32> to vector<8x8xf32>
    %111 = vector.shape_cast %108 : vector<8x8xf32> to vector<1x8x8xf32>
    tpu.vector_store %arg4[%c0_60, %c0_61, %c8_62], %111 {strides = array<i32>} : memref<1x8x32xf32, #tpu.memory_space<vmem>>, vector<1x8x8xf32>,
    %c0_63 = arith.constant 0 : index
    %c0_64 = arith.constant 0 : index
    %c16 = arith.constant 16 : index
    %112 = vector.load %arg1[%c0_63, %c0_64, %c16] : memref<1x8x96xf32, #tpu.memory_space<vmem>>, vector<1x8x8xf32>
    %113 = vector.shape_cast %112 : vector<1x8x8xf32> to vector<8x8xf32>
    %c0_65 = arith.constant 0 : index
    %c0_66 = arith.constant 0 : index
    %c16_67 = arith.constant 16 : index
    %114 = vector.load %arg2[%c0_65, %c0_66, %c16_67] : memref<1x8x96xf32, #tpu.memory_space<vmem>>, vector<1x8x8xf32>
    %115 = vector.shape_cast %114 : vector<1x8x8xf32> to vector<8x8xf32>
    %c0_68 = arith.constant 0 : index
    %c0_69 = arith.constant 0 : index
    %c48 = arith.constant 48 : index
    %116 = vector.load %arg1[%c0_68, %c0_69, %c48] : memref<1x8x96xf32, #tpu.memory_space<vmem>>, vector<1x8x8xf32>
    %117 = vector.shape_cast %116 : vector<1x8x8xf32> to vector<8x8xf32>
    %c0_70 = arith.constant 0 : index
    %c0_71 = arith.constant 0 : index
    %c48_72 = arith.constant 48 : index
    %118 = vector.load %arg2[%c0_70, %c0_71, %c48_72] : memref<1x8x96xf32, #tpu.memory_space<vmem>>, vector<1x8x8xf32>
    %119 = vector.shape_cast %118 : vector<1x8x8xf32> to vector<8x8xf32>
    %c0_73 = arith.constant 0 : index
    %c0_74 = arith.constant 0 : index
    %c80 = arith.constant 80 : index
    %120 = vector.load %arg1[%c0_73, %c0_74, %c80] : memref<1x8x96xf32, #tpu.memory_space<vmem>>, vector<1x8x8xf32>
    %121 = vector.shape_cast %120 : vector<1x8x8xf32> to vector<8x8xf32>
    %c0_75 = arith.constant 0 : index
    %c0_76 = arith.constant 0 : index
    %c80_77 = arith.constant 80 : index
    %122 = vector.load %arg2[%c0_75, %c0_76, %c80_77] : memref<1x8x96xf32, #tpu.memory_space<vmem>>, vector<1x8x8xf32>
    %123 = vector.shape_cast %122 : vector<1x8x8xf32> to vector<8x8xf32>
    %cst_78 = arith.constant dense<0.000000e+00> : vector<8x8xf32>
    %124 = tpu.matmul %113, %117, %cst_78 {dimension_numbers = #tpu.dot_dimension_numbers<[1], [1], [0], [0], [0, 0, 1, 0], [], []>} : vector<8x8xf32>, vector<8x8xf32>, vector<8x8xf32> -> vector<8x8xf32>
    %cst_79 = arith.constant dense<0.000000e+00> : vector<8x8xf32>
    %125 = tpu.matmul %115, %119, %cst_79 {dimension_numbers = #tpu.dot_dimension_numbers<[1], [1], [0], [0], [0, 0, 1, 0], [], []>} : vector<8x8xf32>, vector<8x8xf32>, vector<8x8xf32> -> vector<8x8xf32>
    %126 = arith.addf %113, %115 : vector<8x8xf32>
    %127 = arith.subf %119, %117 : vector<8x8xf32>
    %cst_80 = arith.constant dense<0.000000e+00> : vector<8x8xf32>
    %128 = tpu.matmul %126, %127, %cst_80 {dimension_numbers = #tpu.dot_dimension_numbers<[1], [1], [0], [0], [0, 0, 1, 0], [], []>} : vector<8x8xf32>, vector<8x8xf32>, vector<8x8xf32> -> vector<8x8xf32>
    %129 = arith.addf %124, %125 : vector<8x8xf32>
    %cst_81 = arith.constant 0.353553385 : f32
    %130 = vector.broadcast %cst_81 : f32 to vector<8x8xf32>
    %131 = arith.mulf %129, %130 : vector<8x8xf32>
    %132 = arith.addf %128, %124 : vector<8x8xf32>
    %133 = arith.subf %132, %125 : vector<8x8xf32>
    %cst_82 = arith.constant 0.353553385 : f32
    %134 = vector.broadcast %cst_82 : f32 to vector<8x8xf32>
    %135 = arith.mulf %133, %134 : vector<8x8xf32>
    %136 = arith.mulf %131, %131 : vector<8x8xf32>
    %137 = arith.mulf %135, %135 : vector<8x8xf32>
    %138 = arith.addf %136, %137 : vector<8x8xf32>
    %139 = math.sqrt %138 : vector<8x8xf32>
    %cst_83 = arith.constant dense<0xFF800000> : vector<8xf32>
    %140 = vector.multi_reduction <maximumf>, %139, %cst_83 [1] : vector<8x8xf32> to vector<8xf32>
    %141 = vector.shape_cast %140 : vector<8xf32> to vector<8x1xf32>
    %142 = vector.broadcast %141 : vector<8x1xf32> to vector<8x8xf32>
    %143 = arith.subf %139, %142 : vector<8x8xf32>
    %144 = math.exp %143 : vector<8x8xf32>
    %cst_84 = arith.constant dense<0.000000e+00> : vector<8xf32>
    %145 = vector.multi_reduction <add>, %144, %cst_84 [1] : vector<8x8xf32> to vector<8xf32>
    %146 = vector.shape_cast %145 : vector<8xf32> to vector<8x1xf32>
    %cst_85 = arith.constant 9.99999971E-10 : f32
    %147 = vector.broadcast %cst_85 : f32 to vector<8x8xf32>
    %148 = arith.addf %139, %147 : vector<8x8xf32>
    %149 = vector.broadcast %146 : vector<8x1xf32> to vector<8x8xf32>
    %150 = arith.mulf %149, %148 : vector<8x8xf32>
    %151 = arith.divf %144, %150 : vector<8x8xf32>
    %152 = arith.mulf %131, %151 : vector<8x8xf32>
    %153 = arith.mulf %135, %151 : vector<8x8xf32>
    %cst_86 = arith.constant dense<0.000000e+00> : vector<8x8xf32>
    %154 = tpu.matmul %152, %121, %cst_86 {dimension_numbers = #tpu.dot_dimension_numbers<[1], [0], [0], [1], [0, 0, 1, 1], [], []>} : vector<8x8xf32>, vector<8x8xf32>, vector<8x8xf32> -> vector<8x8xf32>
    %cst_87 = arith.constant dense<0.000000e+00> : vector<8x8xf32>
    %155 = tpu.matmul %153, %123, %cst_87 {dimension_numbers = #tpu.dot_dimension_numbers<[1], [0], [0], [1], [0, 0, 1, 1], [], []>} : vector<8x8xf32>, vector<8x8xf32>, vector<8x8xf32> -> vector<8x8xf32>
    %156 = arith.addf %152, %153 : vector<8x8xf32>
    %157 = arith.addf %121, %123 : vector<8x8xf32>
    %cst_88 = arith.constant dense<0.000000e+00> : vector<8x8xf32>
    %158 = tpu.matmul %156, %157, %cst_88 {dimension_numbers = #tpu.dot_dimension_numbers<[1], [0], [0], [1], [0, 0, 1, 1], [], []>} : vector<8x8xf32>, vector<8x8xf32>, vector<8x8xf32> -> vector<8x8xf32>
    %159 = arith.subf %154, %155 : vector<8x8xf32>
    %c0_89 = arith.constant 0 : index
    %c0_90 = arith.constant 0 : index
    %c16_91 = arith.constant 16 : index
    %160 = vector.load %arg3[%c0_89, %c0_90, %c16_91] : memref<1x8x32xf32, #tpu.memory_space<vmem>>, vector<1x8x8xf32>
    %161 = vector.shape_cast %160 : vector<1x8x8xf32> to vector<8x8xf32>
    %162 = vector.shape_cast %159 : vector<8x8xf32> to vector<1x8x8xf32>
    tpu.vector_store %arg3[%c0_89, %c0_90, %c16_91], %162 {strides = array<i32>} : memref<1x8x32xf32, #tpu.memory_space<vmem>>, vector<1x8x8xf32>,
    %163 = arith.subf %158, %154 : vector<8x8xf32>
    %164 = arith.subf %163, %155 : vector<8x8xf32>
    %c0_92 = arith.constant 0 : index
    %c0_93 = arith.constant 0 : index
    %c16_94 = arith.constant 16 : index
    %165 = vector.load %arg4[%c0_92, %c0_93, %c16_94] : memref<1x8x32xf32, #tpu.memory_space<vmem>>, vector<1x8x8xf32>
    %166 = vector.shape_cast %165 : vector<1x8x8xf32> to vector<8x8xf32>
    %167 = vector.shape_cast %164 : vector<8x8xf32> to vector<1x8x8xf32>
    tpu.vector_store %arg4[%c0_92, %c0_93, %c16_94], %167 {strides = array<i32>} : memref<1x8x32xf32, #tpu.memory_space<vmem>>, vector<1x8x8xf32>,
    %c0_95 = arith.constant 0 : index
    %c0_96 = arith.constant 0 : index
    %c24 = arith.constant 24 : index
    %168 = vector.load %arg1[%c0_95, %c0_96, %c24] : memref<1x8x96xf32, #tpu.memory_space<vmem>>, vector<1x8x8xf32>
    %169 = vector.shape_cast %168 : vector<1x8x8xf32> to vector<8x8xf32>
    %c0_97 = arith.constant 0 : index
    %c0_98 = arith.constant 0 : index
    %c24_99 = arith.constant 24 : index
    %170 = vector.load %arg2[%c0_97, %c0_98, %c24_99] : memref<1x8x96xf32, #tpu.memory_space<vmem>>, vector<1x8x8xf32>
    %171 = vector.shape_cast %170 : vector<1x8x8xf32> to vector<8x8xf32>
    %c0_100 = arith.constant 0 : index
    %c0_101 = arith.constant 0 : index
    %c56 = arith.constant 56 : index
    %172 = vector.load %arg1[%c0_100, %c0_101, %c56] : memref<1x8x96xf32, #tpu.memory_space<vmem>>, vector<1x8x8xf32>
    %173 = vector.shape_cast %172 : vector<1x8x8xf32> to vector<8x8xf32>
    %c0_102 = arith.constant 0 : index
    %c0_103 = arith.constant 0 : index
    %c56_104 = arith.constant 56 : index
    %174 = vector.load %arg2[%c0_102, %c0_103, %c56_104] : memref<1x8x96xf32, #tpu.memory_space<vmem>>, vector<1x8x8xf32>
    %175 = vector.shape_cast %174 : vector<1x8x8xf32> to vector<8x8xf32>
    %c0_105 = arith.constant 0 : index
    %c0_106 = arith.constant 0 : index
    %c88 = arith.constant 88 : index
    %176 = vector.load %arg1[%c0_105, %c0_106, %c88] : memref<1x8x96xf32, #tpu.memory_space<vmem>>, vector<1x8x8xf32>
    %177 = vector.shape_cast %176 : vector<1x8x8xf32> to vector<8x8xf32>
    %c0_107 = arith.constant 0 : index
    %c0_108 = arith.constant 0 : index
    %c88_109 = arith.constant 88 : index
    %178 = vector.load %arg2[%c0_107, %c0_108, %c88_109] : memref<1x8x96xf32, #tpu.memory_space<vmem>>, vector<1x8x8xf32>
    %179 = vector.shape_cast %178 : vector<1x8x8xf32> to vector<8x8xf32>
    %cst_110 = arith.constant dense<0.000000e+00> : vector<8x8xf32>
    %180 = tpu.matmul %169, %173, %cst_110 {dimension_numbers = #tpu.dot_dimension_numbers<[1], [1], [0], [0], [0, 0, 1, 0], [], []>} : vector<8x8xf32>, vector<8x8xf32>, vector<8x8xf32> -> vector<8x8xf32>
    %cst_111 = arith.constant dense<0.000000e+00> : vector<8x8xf32>
    %181 = tpu.matmul %171, %175, %cst_111 {dimension_numbers = #tpu.dot_dimension_numbers<[1], [1], [0], [0], [0, 0, 1, 0], [], []>} : vector<8x8xf32>, vector<8x8xf32>, vector<8x8xf32> -> vector<8x8xf32>
    %182 = arith.addf %169, %171 : vector<8x8xf32>
    %183 = arith.subf %175, %173 : vector<8x8xf32>
    %cst_112 = arith.constant dense<0.000000e+00> : vector<8x8xf32>
    %184 = tpu.matmul %182, %183, %cst_112 {dimension_numbers = #tpu.dot_dimension_numbers<[1], [1], [0], [0], [0, 0, 1, 0], [], []>} : vector<8x8xf32>, vector<8x8xf32>, vector<8x8xf32> -> vector<8x8xf32>
    %185 = arith.addf %180, %181 : vector<8x8xf32>
    %cst_113 = arith.constant 0.353553385 : f32
    %186 = vector.broadcast %cst_113 : f32 to vector<8x8xf32>
    %187 = arith.mulf %185, %186 : vector<8x8xf32>
    %188 = arith.addf %184, %180 : vector<8x8xf32>
    %189 = arith.subf %188, %181 : vector<8x8xf32>
    %cst_114 = arith.constant 0.353553385 : f32
    %190 = vector.broadcast %cst_114 : f32 to vector<8x8xf32>
    %191 = arith.mulf %189, %190 : vector<8x8xf32>
    %192 = arith.mulf %187, %187 : vector<8x8xf32>
    %193 = arith.mulf %191, %191 : vector<8x8xf32>
    %194 = arith.addf %192, %193 : vector<8x8xf32>
    %195 = math.sqrt %194 : vector<8x8xf32>
    %cst_115 = arith.constant dense<0xFF800000> : vector<8xf32>
    %196 = vector.multi_reduction <maximumf>, %195, %cst_115 [1] : vector<8x8xf32> to vector<8xf32>
    %197 = vector.shape_cast %196 : vector<8xf32> to vector<8x1xf32>
    %198 = vector.broadcast %197 : vector<8x1xf32> to vector<8x8xf32>
    %199 = arith.subf %195, %198 : vector<8x8xf32>
    %200 = math.exp %199 : vector<8x8xf32>
    %cst_116 = arith.constant dense<0.000000e+00> : vector<8xf32>
    %201 = vector.multi_reduction <add>, %200, %cst_116 [1] : vector<8x8xf32> to vector<8xf32>
    %202 = vector.shape_cast %201 : vector<8xf32> to vector<8x1xf32>
    %cst_117 = arith.constant 9.99999971E-10 : f32
    %203 = vector.broadcast %cst_117 : f32 to vector<8x8xf32>
    %204 = arith.addf %195, %203 : vector<8x8xf32>
    %205 = vector.broadcast %202 : vector<8x1xf32> to vector<8x8xf32>
    %206 = arith.mulf %205, %204 : vector<8x8xf32>
    %207 = arith.divf %200, %206 : vector<8x8xf32>
    %208 = arith.mulf %187, %207 : vector<8x8xf32>
    %209 = arith.mulf %191, %207 : vector<8x8xf32>
    %cst_118 = arith.constant dense<0.000000e+00> : vector<8x8xf32>
    %210 = tpu.matmul %208, %177, %cst_118 {dimension_numbers = #tpu.dot_dimension_numbers<[1], [0], [0], [1], [0, 0, 1, 1], [], []>} : vector<8x8xf32>, vector<8x8xf32>, vector<8x8xf32> -> vector<8x8xf32>
    %cst_119 = arith.constant dense<0.000000e+00> : vector<8x8xf32>
    %211 = tpu.matmul %209, %179, %cst_119 {dimension_numbers = #tpu.dot_dimension_numbers<[1], [0], [0], [1], [0, 0, 1, 1], [], []>} : vector<8x8xf32>, vector<8x8xf32>, vector<8x8xf32> -> vector<8x8xf32>
    %212 = arith.addf %208, %209 : vector<8x8xf32>
    %213 = arith.addf %177, %179 : vector<8x8xf32>
    %cst_120 = arith.constant dense<0.000000e+00> : vector<8x8xf32>
    %214 = tpu.matmul %212, %213, %cst_120 {dimension_numbers = #tpu.dot_dimension_numbers<[1], [0], [0], [1], [0, 0, 1, 1], [], []>} : vector<8x8xf32>, vector<8x8xf32>, vector<8x8xf32> -> vector<8x8xf32>
    %215 = arith.subf %210, %211 : vector<8x8xf32>
    %c0_121 = arith.constant 0 : index
    %c0_122 = arith.constant 0 : index
    %c24_123 = arith.constant 24 : index
    %216 = vector.load %arg3[%c0_121, %c0_122, %c24_123] : memref<1x8x32xf32, #tpu.memory_space<vmem>>, vector<1x8x8xf32>
    %217 = vector.shape_cast %216 : vector<1x8x8xf32> to vector<8x8xf32>
    %218 = vector.shape_cast %215 : vector<8x8xf32> to vector<1x8x8xf32>
    tpu.vector_store %arg3[%c0_121, %c0_122, %c24_123], %218 {strides = array<i32>} : memref<1x8x32xf32, #tpu.memory_space<vmem>>, vector<1x8x8xf32>,
    %219 = arith.subf %214, %210 : vector<8x8xf32>
    %220 = arith.subf %219, %211 : vector<8x8xf32>
    %c0_124 = arith.constant 0 : index
    %c0_125 = arith.constant 0 : index
    %c24_126 = arith.constant 24 : index
    %221 = vector.load %arg4[%c0_124, %c0_125, %c24_126] : memref<1x8x32xf32, #tpu.memory_space<vmem>>, vector<1x8x8xf32>
    %222 = vector.shape_cast %221 : vector<1x8x8xf32> to vector<8x8xf32>
    %223 = vector.shape_cast %220 : vector<8x8xf32> to vector<1x8x8xf32>
    tpu.vector_store %arg4[%c0_124, %c0_125, %c24_126], %223 {strides = array<i32>} : memref<1x8x32xf32, #tpu.memory_space<vmem>>, vector<1x8x8xf32>,
    return
  }
  func.func @transform_0(%arg0: i32) -> (i32, i32, i32) {
    %c0_i32 = arith.constant 0 : i32
    %c0_i32_0 = arith.constant 0 : i32
    %c0_i32_1 = arith.constant 0 : i32
    return %arg0, %c0_i32, %c0_i32_0 : i32, i32, i32
  }
  func.func @transform_1(%arg0: i32) -> (i32, i32, i32) {
    %c0_i32 = arith.constant 0 : i32
    %c0_i32_0 = arith.constant 0 : i32
    %c0_i32_1 = arith.constant 0 : i32
    return %arg0, %c0_i32, %c0_i32_0 : i32, i32, i32
  }
  func.func @transform_2(%arg0: i32) -> (i32, i32, i32) {
    %c0_i32 = arith.constant 0 : i32
    %c0_i32_0 = arith.constant 0 : i32
    %c0_i32_1 = arith.constant 0 : i32
    return %arg0, %c0_i32, %c0_i32_0 : i32, i32, i32
  }
  func.func @transform_3(%arg0: i32) -> (i32, i32, i32) {
    %c0_i32 = arith.constant 0 : i32
    %c0_i32_0 = arith.constant 0 : i32
    %c0_i32_1 = arith.constant 0 : i32
    return %arg0, %c0_i32, %c0_i32_0 : i32, i32, i32
  }
}

module attributes {stable_mosaic.version = 11 : i64} {
  func.func @_ffn_addnorm_kernel(%arg0: i32, %arg1: memref<16x32xf32, #tpu.memory_space<vmem>>, %arg2: memref<16x32xf32, #tpu.memory_space<vmem>>, %arg3: memref<32x32xf32, #tpu.memory_space<vmem>>, %arg4: memref<32x32xf32, #tpu.memory_space<vmem>>, %arg5: memref<1x32xf32, #tpu.memory_space<vmem>>, %arg6: memref<1x32xf32, #tpu.memory_space<vmem>>, %arg7: memref<32x32xf32, #tpu.memory_space<vmem>>, %arg8: memref<32x32xf32, #tpu.memory_space<vmem>>, %arg9: memref<1x32xf32, #tpu.memory_space<vmem>>, %arg10: memref<1x32xf32, #tpu.memory_space<vmem>>, %arg11: memref<1x32xf32, #tpu.memory_space<vmem>>, %arg12: memref<1x32xf32, #tpu.memory_space<vmem>>, %arg13: memref<1x32xf32, #tpu.memory_space<vmem>>, %arg14: memref<1x32xf32, #tpu.memory_space<vmem>>, %arg15: memref<1x32xf32, #tpu.memory_space<vmem>>, %arg16: memref<16x32xf32, #tpu.memory_space<vmem>>, %arg17: memref<16x32xf32, #tpu.memory_space<vmem>>) attributes {dimension_semantics = [#tpu.dimension_semantics<parallel>], iteration_bounds = array<i64: 1>, scalar_prefetch = 0 : i64, scratch_operands = 0 : i64, tpu.core_type = #tpu.core_type<tc>, window_params = [{transform_indices = @transform_0, window_bounds = array<i64: 16, 32>}, {transform_indices = @transform_1, window_bounds = array<i64: 16, 32>}, {pipeline_mode = #tpu.pipeline_mode<synchronous>, transform_indices = @transform_2, window_bounds = array<i64: 32, 32>}, {pipeline_mode = #tpu.pipeline_mode<synchronous>, transform_indices = @transform_3, window_bounds = array<i64: 32, 32>}, {pipeline_mode = #tpu.pipeline_mode<synchronous>, transform_indices = @transform_4, window_bounds = array<i64: 1, 32>}, {pipeline_mode = #tpu.pipeline_mode<synchronous>, transform_indices = @transform_5, window_bounds = array<i64: 1, 32>}, {pipeline_mode = #tpu.pipeline_mode<synchronous>, transform_indices = @transform_6, window_bounds = array<i64: 32, 32>}, {pipeline_mode = #tpu.pipeline_mode<synchronous>, transform_indices = @transform_7, window_bounds = array<i64: 32, 32>}, {pipeline_mode = #tpu.pipeline_mode<synchronous>, transform_indices = @transform_8, window_bounds = array<i64: 1, 32>}, {pipeline_mode = #tpu.pipeline_mode<synchronous>, transform_indices = @transform_9, window_bounds = array<i64: 1, 32>}, {pipeline_mode = #tpu.pipeline_mode<synchronous>, transform_indices = @transform_10, window_bounds = array<i64: 1, 32>}, {pipeline_mode = #tpu.pipeline_mode<synchronous>, transform_indices = @transform_11, window_bounds = array<i64: 1, 32>}, {pipeline_mode = #tpu.pipeline_mode<synchronous>, transform_indices = @transform_12, window_bounds = array<i64: 1, 32>}, {pipeline_mode = #tpu.pipeline_mode<synchronous>, transform_indices = @transform_13, window_bounds = array<i64: 1, 32>}, {pipeline_mode = #tpu.pipeline_mode<synchronous>, transform_indices = @transform_14, window_bounds = array<i64: 1, 32>}, {transform_indices = @transform_15, window_bounds = array<i64: 16, 32>}, {transform_indices = @transform_16, window_bounds = array<i64: 16, 32>}]} {
    %c0 = arith.constant 0 : index
    %c0_0 = arith.constant 0 : index
    %0 = vector.load %arg1[%c0, %c0_0] : memref<16x32xf32, #tpu.memory_space<vmem>>, vector<16x32xf32>
    %c0_1 = arith.constant 0 : index
    %c0_2 = arith.constant 0 : index
    %1 = vector.load %arg2[%c0_1, %c0_2] : memref<16x32xf32, #tpu.memory_space<vmem>>, vector<16x32xf32>
    %c0_3 = arith.constant 0 : index
    %c0_4 = arith.constant 0 : index
    %2 = vector.load %arg3[%c0_3, %c0_4] : memref<32x32xf32, #tpu.memory_space<vmem>>, vector<32x32xf32>
    %c0_5 = arith.constant 0 : index
    %c0_6 = arith.constant 0 : index
    %3 = vector.load %arg4[%c0_5, %c0_6] : memref<32x32xf32, #tpu.memory_space<vmem>>, vector<32x32xf32>
    %c0_7 = arith.constant 0 : index
    %c0_8 = arith.constant 0 : index
    %4 = vector.load %arg5[%c0_7, %c0_8] : memref<1x32xf32, #tpu.memory_space<vmem>>, vector<1x32xf32>
    %c0_9 = arith.constant 0 : index
    %c0_10 = arith.constant 0 : index
    %5 = vector.load %arg6[%c0_9, %c0_10] : memref<1x32xf32, #tpu.memory_space<vmem>>, vector<1x32xf32>
    %cst = arith.constant dense<0.000000e+00> : vector<16x32xf32>
    %6 = tpu.matmul %0, %2, %cst {dimension_numbers = #tpu.dot_dimension_numbers<[1], [0], [0], [1], [0, 0, 1, 1], [], []>} : vector<16x32xf32>, vector<32x32xf32>, vector<16x32xf32> -> vector<16x32xf32>
    %cst_11 = arith.constant dense<0.000000e+00> : vector<16x32xf32>
    %7 = tpu.matmul %1, %3, %cst_11 {dimension_numbers = #tpu.dot_dimension_numbers<[1], [0], [0], [1], [0, 0, 1, 1], [], []>} : vector<16x32xf32>, vector<32x32xf32>, vector<16x32xf32> -> vector<16x32xf32>
    %8 = arith.addf %0, %1 : vector<16x32xf32>
    %9 = arith.addf %2, %3 : vector<32x32xf32>
    %cst_12 = arith.constant dense<0.000000e+00> : vector<16x32xf32>
    %10 = tpu.matmul %8, %9, %cst_12 {dimension_numbers = #tpu.dot_dimension_numbers<[1], [0], [0], [1], [0, 0, 1, 1], [], []>} : vector<16x32xf32>, vector<32x32xf32>, vector<16x32xf32> -> vector<16x32xf32>
    %11 = arith.subf %6, %7 : vector<16x32xf32>
    %12 = arith.subf %4, %5 : vector<1x32xf32>
    %13 = vector.broadcast %12 : vector<1x32xf32> to vector<16x32xf32>
    %14 = arith.addf %11, %13 : vector<16x32xf32>
    %15 = arith.subf %10, %6 : vector<16x32xf32>
    %16 = arith.subf %15, %7 : vector<16x32xf32>
    %17 = arith.addf %4, %5 : vector<1x32xf32>
    %18 = vector.broadcast %17 : vector<1x32xf32> to vector<16x32xf32>
    %19 = arith.addf %16, %18 : vector<16x32xf32>
    %20 = arith.negf %14 : vector<16x32xf32>
    %21 = math.exp %20 : vector<16x32xf32>
    %cst_13 = arith.constant 1.000000e+00 : f32
    %22 = vector.broadcast %cst_13 : f32 to vector<16x32xf32>
    %23 = arith.addf %22, %21 : vector<16x32xf32>
    %24 = arith.divf %22, %23 : vector<16x32xf32>
    %25 = arith.mulf %14, %24 : vector<16x32xf32>
    %26 = arith.negf %19 : vector<16x32xf32>
    %27 = math.exp %26 : vector<16x32xf32>
    %cst_14 = arith.constant 1.000000e+00 : f32
    %28 = vector.broadcast %cst_14 : f32 to vector<16x32xf32>
    %29 = arith.addf %28, %27 : vector<16x32xf32>
    %30 = arith.divf %28, %29 : vector<16x32xf32>
    %31 = arith.mulf %19, %30 : vector<16x32xf32>
    %c0_15 = arith.constant 0 : index
    %c0_16 = arith.constant 0 : index
    %32 = vector.load %arg7[%c0_15, %c0_16] : memref<32x32xf32, #tpu.memory_space<vmem>>, vector<32x32xf32>
    %c0_17 = arith.constant 0 : index
    %c0_18 = arith.constant 0 : index
    %33 = vector.load %arg8[%c0_17, %c0_18] : memref<32x32xf32, #tpu.memory_space<vmem>>, vector<32x32xf32>
    %c0_19 = arith.constant 0 : index
    %c0_20 = arith.constant 0 : index
    %34 = vector.load %arg9[%c0_19, %c0_20] : memref<1x32xf32, #tpu.memory_space<vmem>>, vector<1x32xf32>
    %c0_21 = arith.constant 0 : index
    %c0_22 = arith.constant 0 : index
    %35 = vector.load %arg10[%c0_21, %c0_22] : memref<1x32xf32, #tpu.memory_space<vmem>>, vector<1x32xf32>
    %cst_23 = arith.constant dense<0.000000e+00> : vector<16x32xf32>
    %36 = tpu.matmul %25, %32, %cst_23 {dimension_numbers = #tpu.dot_dimension_numbers<[1], [0], [0], [1], [0, 0, 1, 1], [], []>} : vector<16x32xf32>, vector<32x32xf32>, vector<16x32xf32> -> vector<16x32xf32>
    %cst_24 = arith.constant dense<0.000000e+00> : vector<16x32xf32>
    %37 = tpu.matmul %31, %33, %cst_24 {dimension_numbers = #tpu.dot_dimension_numbers<[1], [0], [0], [1], [0, 0, 1, 1], [], []>} : vector<16x32xf32>, vector<32x32xf32>, vector<16x32xf32> -> vector<16x32xf32>
    %38 = arith.addf %25, %31 : vector<16x32xf32>
    %39 = arith.addf %32, %33 : vector<32x32xf32>
    %cst_25 = arith.constant dense<0.000000e+00> : vector<16x32xf32>
    %40 = tpu.matmul %38, %39, %cst_25 {dimension_numbers = #tpu.dot_dimension_numbers<[1], [0], [0], [1], [0, 0, 1, 1], [], []>} : vector<16x32xf32>, vector<32x32xf32>, vector<16x32xf32> -> vector<16x32xf32>
    %41 = arith.subf %36, %37 : vector<16x32xf32>
    %42 = arith.subf %34, %35 : vector<1x32xf32>
    %43 = vector.broadcast %42 : vector<1x32xf32> to vector<16x32xf32>
    %44 = arith.addf %41, %43 : vector<16x32xf32>
    %45 = arith.subf %40, %36 : vector<16x32xf32>
    %46 = arith.subf %45, %37 : vector<16x32xf32>
    %47 = arith.addf %34, %35 : vector<1x32xf32>
    %48 = vector.broadcast %47 : vector<1x32xf32> to vector<16x32xf32>
    %49 = arith.addf %46, %48 : vector<16x32xf32>
    %50 = arith.addf %0, %44 : vector<16x32xf32>
    %51 = arith.addf %1, %49 : vector<16x32xf32>
    %c0_26 = arith.constant 0 : index
    %c0_27 = arith.constant 0 : index
    %52 = vector.load %arg11[%c0_26, %c0_27] : memref<1x32xf32, #tpu.memory_space<vmem>>, vector<1x32xf32>
    %c0_28 = arith.constant 0 : index
    %c0_29 = arith.constant 0 : index
    %53 = vector.load %arg12[%c0_28, %c0_29] : memref<1x32xf32, #tpu.memory_space<vmem>>, vector<1x32xf32>
    %c0_30 = arith.constant 0 : index
    %c0_31 = arith.constant 0 : index
    %54 = vector.load %arg13[%c0_30, %c0_31] : memref<1x32xf32, #tpu.memory_space<vmem>>, vector<1x32xf32>
    %c0_32 = arith.constant 0 : index
    %c0_33 = arith.constant 0 : index
    %55 = vector.load %arg14[%c0_32, %c0_33] : memref<1x32xf32, #tpu.memory_space<vmem>>, vector<1x32xf32>
    %c0_34 = arith.constant 0 : index
    %c0_35 = arith.constant 0 : index
    %56 = vector.load %arg15[%c0_34, %c0_35] : memref<1x32xf32, #tpu.memory_space<vmem>>, vector<1x32xf32>
    %cst_36 = arith.constant dense<0.000000e+00> : vector<16xf32>
    %57 = vector.multi_reduction <add>, %50, %cst_36 [1] : vector<16x32xf32> to vector<16xf32>
    %58 = vector.shape_cast %57 : vector<16xf32> to vector<16x1xf32>
    %cst_37 = arith.constant 3.200000e+01 : f32
    %59 = vector.broadcast %cst_37 : f32 to vector<16x1xf32>
    %60 = arith.divf %58, %59 : vector<16x1xf32>
    %cst_38 = arith.constant dense<0.000000e+00> : vector<16xf32>
    %61 = vector.multi_reduction <add>, %51, %cst_38 [1] : vector<16x32xf32> to vector<16xf32>
    %62 = vector.shape_cast %61 : vector<16xf32> to vector<16x1xf32>
    %cst_39 = arith.constant 3.200000e+01 : f32
    %63 = vector.broadcast %cst_39 : f32 to vector<16x1xf32>
    %64 = arith.divf %62, %63 : vector<16x1xf32>
    %65 = vector.broadcast %60 : vector<16x1xf32> to vector<16x32xf32>
    %66 = arith.subf %50, %65 : vector<16x32xf32>
    %67 = arith.mulf %66, %66 : vector<16x32xf32>
    %cst_40 = arith.constant dense<0.000000e+00> : vector<16xf32>
    %68 = vector.multi_reduction <add>, %67, %cst_40 [1] : vector<16x32xf32> to vector<16xf32>
    %69 = vector.shape_cast %68 : vector<16xf32> to vector<16x1xf32>
    %70 = vector.broadcast %64 : vector<16x1xf32> to vector<16x32xf32>
    %71 = arith.subf %51, %70 : vector<16x32xf32>
    %72 = arith.mulf %71, %71 : vector<16x32xf32>
    %cst_41 = arith.constant dense<0.000000e+00> : vector<16xf32>
    %73 = vector.multi_reduction <add>, %72, %cst_41 [1] : vector<16x32xf32> to vector<16xf32>
    %74 = vector.shape_cast %73 : vector<16xf32> to vector<16x1xf32>
    %75 = arith.addf %69, %74 : vector<16x1xf32>
    %cst_42 = arith.constant 3.100000e+01 : f32
    %76 = vector.broadcast %cst_42 : f32 to vector<16x1xf32>
    %77 = arith.divf %75, %76 : vector<16x1xf32>
    %cst_43 = arith.constant 9.99999971E-10 : f32
    %78 = vector.broadcast %cst_43 : f32 to vector<16x1xf32>
    %79 = arith.addf %77, %78 : vector<16x1xf32>
    %80 = math.rsqrt %79 : vector<16x1xf32>
    %81 = vector.broadcast %60 : vector<16x1xf32> to vector<16x32xf32>
    %82 = arith.subf %50, %81 : vector<16x32xf32>
    %83 = vector.broadcast %80 : vector<16x1xf32> to vector<16x32xf32>
    %84 = arith.mulf %82, %83 : vector<16x32xf32>
    %85 = vector.broadcast %64 : vector<16x1xf32> to vector<16x32xf32>
    %86 = arith.subf %51, %85 : vector<16x32xf32>
    %87 = vector.broadcast %80 : vector<16x1xf32> to vector<16x32xf32>
    %88 = arith.mulf %86, %87 : vector<16x32xf32>
    %89 = vector.broadcast %52 : vector<1x32xf32> to vector<16x32xf32>
    %90 = arith.mulf %84, %89 : vector<16x32xf32>
    %91 = vector.broadcast %54 : vector<1x32xf32> to vector<16x32xf32>
    %92 = arith.mulf %88, %91 : vector<16x32xf32>
    %93 = arith.addf %90, %92 : vector<16x32xf32>
    %94 = vector.broadcast %55 : vector<1x32xf32> to vector<16x32xf32>
    %95 = arith.addf %93, %94 : vector<16x32xf32>
    %96 = vector.broadcast %54 : vector<1x32xf32> to vector<16x32xf32>
    %97 = arith.mulf %84, %96 : vector<16x32xf32>
    %98 = vector.broadcast %53 : vector<1x32xf32> to vector<16x32xf32>
    %99 = arith.mulf %88, %98 : vector<16x32xf32>
    %100 = arith.addf %97, %99 : vector<16x32xf32>
    %101 = vector.broadcast %56 : vector<1x32xf32> to vector<16x32xf32>
    %102 = arith.addf %100, %101 : vector<16x32xf32>
    %c0_44 = arith.constant 0 : index
    %c0_45 = arith.constant 0 : index
    %103 = vector.load %arg16[%c0_44, %c0_45] : memref<16x32xf32, #tpu.memory_space<vmem>>, vector<16x32xf32>
    tpu.vector_store %arg16[%c0_44, %c0_45], %95 {strides = array<i32>} : memref<16x32xf32, #tpu.memory_space<vmem>>, vector<16x32xf32>,
    %c0_46 = arith.constant 0 : index
    %c0_47 = arith.constant 0 : index
    %104 = vector.load %arg17[%c0_46, %c0_47] : memref<16x32xf32, #tpu.memory_space<vmem>>, vector<16x32xf32>
    tpu.vector_store %arg17[%c0_46, %c0_47], %102 {strides = array<i32>} : memref<16x32xf32, #tpu.memory_space<vmem>>, vector<16x32xf32>,
    return
  }
  func.func @transform_0(%arg0: i32) -> (i32, i32) {
    %c0_i32 = arith.constant 0 : i32
    %c0_i32_0 = arith.constant 0 : i32
    return %arg0, %c0_i32 : i32, i32
  }
  func.func @transform_1(%arg0: i32) -> (i32, i32) {
    %c0_i32 = arith.constant 0 : i32
    %c0_i32_0 = arith.constant 0 : i32
    return %arg0, %c0_i32 : i32, i32
  }
  func.func @transform_2(%arg0: i32) -> (i32, i32) {
    %c0_i32 = arith.constant 0 : i32
    %c0_i32_0 = arith.constant 0 : i32
    %c0_i32_1 = arith.constant 0 : i32
    return %c0_i32, %c0_i32_0 : i32, i32
  }
  func.func @transform_3(%arg0: i32) -> (i32, i32) {
    %c0_i32 = arith.constant 0 : i32
    %c0_i32_0 = arith.constant 0 : i32
    %c0_i32_1 = arith.constant 0 : i32
    return %c0_i32, %c0_i32_0 : i32, i32
  }
  func.func @transform_4(%arg0: i32) -> (i32, i32) {
    %c0_i32 = arith.constant 0 : i32
    %c0_i32_0 = arith.constant 0 : i32
    %c0_i32_1 = arith.constant 0 : i32
    return %c0_i32, %c0_i32_0 : i32, i32
  }
  func.func @transform_5(%arg0: i32) -> (i32, i32) {
    %c0_i32 = arith.constant 0 : i32
    %c0_i32_0 = arith.constant 0 : i32
    %c0_i32_1 = arith.constant 0 : i32
    return %c0_i32, %c0_i32_0 : i32, i32
  }
  func.func @transform_6(%arg0: i32) -> (i32, i32) {
    %c0_i32 = arith.constant 0 : i32
    %c0_i32_0 = arith.constant 0 : i32
    %c0_i32_1 = arith.constant 0 : i32
    return %c0_i32, %c0_i32_0 : i32, i32
  }
  func.func @transform_7(%arg0: i32) -> (i32, i32) {
    %c0_i32 = arith.constant 0 : i32
    %c0_i32_0 = arith.constant 0 : i32
    %c0_i32_1 = arith.constant 0 : i32
    return %c0_i32, %c0_i32_0 : i32, i32
  }
  func.func @transform_8(%arg0: i32) -> (i32, i32) {
    %c0_i32 = arith.constant 0 : i32
    %c0_i32_0 = arith.constant 0 : i32
    %c0_i32_1 = arith.constant 0 : i32
    return %c0_i32, %c0_i32_0 : i32, i32
  }
  func.func @transform_9(%arg0: i32) -> (i32, i32) {
    %c0_i32 = arith.constant 0 : i32
    %c0_i32_0 = arith.constant 0 : i32
    %c0_i32_1 = arith.constant 0 : i32
    return %c0_i32, %c0_i32_0 : i32, i32
  }
  func.func @transform_10(%arg0: i32) -> (i32, i32) {
    %c0_i32 = arith.constant 0 : i32
    %c0_i32_0 = arith.constant 0 : i32
    %c0_i32_1 = arith.constant 0 : i32
    return %c0_i32, %c0_i32_0 : i32, i32
  }
  func.func @transform_11(%arg0: i32) -> (i32, i32) {
    %c0_i32 = arith.constant 0 : i32
    %c0_i32_0 = arith.constant 0 : i32
    %c0_i32_1 = arith.constant 0 : i32
    return %c0_i32, %c0_i32_0 : i32, i32
  }
  func.func @transform_12(%arg0: i32) -> (i32, i32) {
    %c0_i32 = arith.constant 0 : i32
    %c0_i32_0 = arith.constant 0 : i32
    %c0_i32_1 = arith.constant 0 : i32
    return %c0_i32, %c0_i32_0 : i32, i32
  }
  func.func @transform_13(%arg0: i32) -> (i32, i32) {
    %c0_i32 = arith.constant 0 : i32
    %c0_i32_0 = arith.constant 0 : i32
    %c0_i32_1 = arith.constant 0 : i32
    return %c0_i32, %c0_i32_0 : i32, i32
  }
  func.func @transform_14(%arg0: i32) -> (i32, i32) {
    %c0_i32 = arith.constant 0 : i32
    %c0_i32_0 = arith.constant 0 : i32
    %c0_i32_1 = arith.constant 0 : i32
    return %c0_i32, %c0_i32_0 : i32, i32
  }
  func.func @transform_15(%arg0: i32) -> (i32, i32) {
    %c0_i32 = arith.constant 0 : i32
    %c0_i32_0 = arith.constant 0 : i32
    return %arg0, %c0_i32 : i32, i32
  }
  func.func @transform_16(%arg0: i32) -> (i32, i32) {
    %c0_i32 = arith.constant 0 : i32
    %c0_i32_0 = arith.constant 0 : i32
    return %arg0, %c0_i32 : i32, i32
  }
}

module attributes {stable_mosaic.version = 11 : i64} {
  func.func @_oproj_addnorm_kernel(%arg0: i32, %arg1: memref<16x32xf32, #tpu.memory_space<vmem>>, %arg2: memref<16x32xf32, #tpu.memory_space<vmem>>, %arg3: memref<16x32xf32, #tpu.memory_space<vmem>>, %arg4: memref<16x32xf32, #tpu.memory_space<vmem>>, %arg5: memref<32x32xf32, #tpu.memory_space<vmem>>, %arg6: memref<32x32xf32, #tpu.memory_space<vmem>>, %arg7: memref<1x32xf32, #tpu.memory_space<vmem>>, %arg8: memref<1x32xf32, #tpu.memory_space<vmem>>, %arg9: memref<1x32xf32, #tpu.memory_space<vmem>>, %arg10: memref<1x32xf32, #tpu.memory_space<vmem>>, %arg11: memref<1x32xf32, #tpu.memory_space<vmem>>, %arg12: memref<16x32xf32, #tpu.memory_space<vmem>>, %arg13: memref<16x32xf32, #tpu.memory_space<vmem>>) attributes {dimension_semantics = [#tpu.dimension_semantics<parallel>], iteration_bounds = array<i64: 1>, scalar_prefetch = 0 : i64, scratch_operands = 0 : i64, tpu.core_type = #tpu.core_type<tc>, window_params = [{transform_indices = @transform_0, window_bounds = array<i64: 16, 32>}, {transform_indices = @transform_1, window_bounds = array<i64: 16, 32>}, {transform_indices = @transform_2, window_bounds = array<i64: 16, 32>}, {transform_indices = @transform_3, window_bounds = array<i64: 16, 32>}, {pipeline_mode = #tpu.pipeline_mode<synchronous>, transform_indices = @transform_4, window_bounds = array<i64: 32, 32>}, {pipeline_mode = #tpu.pipeline_mode<synchronous>, transform_indices = @transform_5, window_bounds = array<i64: 32, 32>}, {pipeline_mode = #tpu.pipeline_mode<synchronous>, transform_indices = @transform_6, window_bounds = array<i64: 1, 32>}, {pipeline_mode = #tpu.pipeline_mode<synchronous>, transform_indices = @transform_7, window_bounds = array<i64: 1, 32>}, {pipeline_mode = #tpu.pipeline_mode<synchronous>, transform_indices = @transform_8, window_bounds = array<i64: 1, 32>}, {pipeline_mode = #tpu.pipeline_mode<synchronous>, transform_indices = @transform_9, window_bounds = array<i64: 1, 32>}, {pipeline_mode = #tpu.pipeline_mode<synchronous>, transform_indices = @transform_10, window_bounds = array<i64: 1, 32>}, {transform_indices = @transform_11, window_bounds = array<i64: 16, 32>}, {transform_indices = @transform_12, window_bounds = array<i64: 16, 32>}]} {
    %c0 = arith.constant 0 : index
    %c0_0 = arith.constant 0 : index
    %0 = vector.load %arg1[%c0, %c0_0] : memref<16x32xf32, #tpu.memory_space<vmem>>, vector<16x32xf32>
    %c0_1 = arith.constant 0 : index
    %c0_2 = arith.constant 0 : index
    %1 = vector.load %arg2[%c0_1, %c0_2] : memref<16x32xf32, #tpu.memory_space<vmem>>, vector<16x32xf32>
    %c0_3 = arith.constant 0 : index
    %c0_4 = arith.constant 0 : index
    %2 = vector.load %arg5[%c0_3, %c0_4] : memref<32x32xf32, #tpu.memory_space<vmem>>, vector<32x32xf32>
    %c0_5 = arith.constant 0 : index
    %c0_6 = arith.constant 0 : index
    %3 = vector.load %arg6[%c0_5, %c0_6] : memref<32x32xf32, #tpu.memory_space<vmem>>, vector<32x32xf32>
    %cst = arith.constant dense<0.000000e+00> : vector<16x32xf32>
    %4 = tpu.matmul %0, %2, %cst {dimension_numbers = #tpu.dot_dimension_numbers<[1], [0], [0], [1], [0, 0, 1, 1], [], []>} : vector<16x32xf32>, vector<32x32xf32>, vector<16x32xf32> -> vector<16x32xf32>
    %cst_7 = arith.constant dense<0.000000e+00> : vector<16x32xf32>
    %5 = tpu.matmul %1, %3, %cst_7 {dimension_numbers = #tpu.dot_dimension_numbers<[1], [0], [0], [1], [0, 0, 1, 1], [], []>} : vector<16x32xf32>, vector<32x32xf32>, vector<16x32xf32> -> vector<16x32xf32>
    %6 = arith.addf %0, %1 : vector<16x32xf32>
    %7 = arith.addf %2, %3 : vector<32x32xf32>
    %cst_8 = arith.constant dense<0.000000e+00> : vector<16x32xf32>
    %8 = tpu.matmul %6, %7, %cst_8 {dimension_numbers = #tpu.dot_dimension_numbers<[1], [0], [0], [1], [0, 0, 1, 1], [], []>} : vector<16x32xf32>, vector<32x32xf32>, vector<16x32xf32> -> vector<16x32xf32>
    %9 = arith.subf %4, %5 : vector<16x32xf32>
    %10 = arith.subf %8, %4 : vector<16x32xf32>
    %11 = arith.subf %10, %5 : vector<16x32xf32>
    %c0_9 = arith.constant 0 : index
    %c0_10 = arith.constant 0 : index
    %12 = vector.load %arg3[%c0_9, %c0_10] : memref<16x32xf32, #tpu.memory_space<vmem>>, vector<16x32xf32>
    %13 = arith.addf %12, %9 : vector<16x32xf32>
    %c0_11 = arith.constant 0 : index
    %c0_12 = arith.constant 0 : index
    %14 = vector.load %arg4[%c0_11, %c0_12] : memref<16x32xf32, #tpu.memory_space<vmem>>, vector<16x32xf32>
    %15 = arith.addf %14, %11 : vector<16x32xf32>
    %c0_13 = arith.constant 0 : index
    %c0_14 = arith.constant 0 : index
    %16 = vector.load %arg7[%c0_13, %c0_14] : memref<1x32xf32, #tpu.memory_space<vmem>>, vector<1x32xf32>
    %c0_15 = arith.constant 0 : index
    %c0_16 = arith.constant 0 : index
    %17 = vector.load %arg8[%c0_15, %c0_16] : memref<1x32xf32, #tpu.memory_space<vmem>>, vector<1x32xf32>
    %c0_17 = arith.constant 0 : index
    %c0_18 = arith.constant 0 : index
    %18 = vector.load %arg9[%c0_17, %c0_18] : memref<1x32xf32, #tpu.memory_space<vmem>>, vector<1x32xf32>
    %c0_19 = arith.constant 0 : index
    %c0_20 = arith.constant 0 : index
    %19 = vector.load %arg10[%c0_19, %c0_20] : memref<1x32xf32, #tpu.memory_space<vmem>>, vector<1x32xf32>
    %c0_21 = arith.constant 0 : index
    %c0_22 = arith.constant 0 : index
    %20 = vector.load %arg11[%c0_21, %c0_22] : memref<1x32xf32, #tpu.memory_space<vmem>>, vector<1x32xf32>
    %cst_23 = arith.constant dense<0.000000e+00> : vector<16xf32>
    %21 = vector.multi_reduction <add>, %13, %cst_23 [1] : vector<16x32xf32> to vector<16xf32>
    %22 = vector.shape_cast %21 : vector<16xf32> to vector<16x1xf32>
    %cst_24 = arith.constant 3.200000e+01 : f32
    %23 = vector.broadcast %cst_24 : f32 to vector<16x1xf32>
    %24 = arith.divf %22, %23 : vector<16x1xf32>
    %cst_25 = arith.constant dense<0.000000e+00> : vector<16xf32>
    %25 = vector.multi_reduction <add>, %15, %cst_25 [1] : vector<16x32xf32> to vector<16xf32>
    %26 = vector.shape_cast %25 : vector<16xf32> to vector<16x1xf32>
    %cst_26 = arith.constant 3.200000e+01 : f32
    %27 = vector.broadcast %cst_26 : f32 to vector<16x1xf32>
    %28 = arith.divf %26, %27 : vector<16x1xf32>
    %29 = vector.broadcast %24 : vector<16x1xf32> to vector<16x32xf32>
    %30 = arith.subf %13, %29 : vector<16x32xf32>
    %31 = arith.mulf %30, %30 : vector<16x32xf32>
    %cst_27 = arith.constant dense<0.000000e+00> : vector<16xf32>
    %32 = vector.multi_reduction <add>, %31, %cst_27 [1] : vector<16x32xf32> to vector<16xf32>
    %33 = vector.shape_cast %32 : vector<16xf32> to vector<16x1xf32>
    %34 = vector.broadcast %28 : vector<16x1xf32> to vector<16x32xf32>
    %35 = arith.subf %15, %34 : vector<16x32xf32>
    %36 = arith.mulf %35, %35 : vector<16x32xf32>
    %cst_28 = arith.constant dense<0.000000e+00> : vector<16xf32>
    %37 = vector.multi_reduction <add>, %36, %cst_28 [1] : vector<16x32xf32> to vector<16xf32>
    %38 = vector.shape_cast %37 : vector<16xf32> to vector<16x1xf32>
    %39 = arith.addf %33, %38 : vector<16x1xf32>
    %cst_29 = arith.constant 3.100000e+01 : f32
    %40 = vector.broadcast %cst_29 : f32 to vector<16x1xf32>
    %41 = arith.divf %39, %40 : vector<16x1xf32>
    %cst_30 = arith.constant 9.99999971E-10 : f32
    %42 = vector.broadcast %cst_30 : f32 to vector<16x1xf32>
    %43 = arith.addf %41, %42 : vector<16x1xf32>
    %44 = math.rsqrt %43 : vector<16x1xf32>
    %45 = vector.broadcast %24 : vector<16x1xf32> to vector<16x32xf32>
    %46 = arith.subf %13, %45 : vector<16x32xf32>
    %47 = vector.broadcast %44 : vector<16x1xf32> to vector<16x32xf32>
    %48 = arith.mulf %46, %47 : vector<16x32xf32>
    %49 = vector.broadcast %28 : vector<16x1xf32> to vector<16x32xf32>
    %50 = arith.subf %15, %49 : vector<16x32xf32>
    %51 = vector.broadcast %44 : vector<16x1xf32> to vector<16x32xf32>
    %52 = arith.mulf %50, %51 : vector<16x32xf32>
    %53 = vector.broadcast %16 : vector<1x32xf32> to vector<16x32xf32>
    %54 = arith.mulf %48, %53 : vector<16x32xf32>
    %55 = vector.broadcast %18 : vector<1x32xf32> to vector<16x32xf32>
    %56 = arith.mulf %52, %55 : vector<16x32xf32>
    %57 = arith.addf %54, %56 : vector<16x32xf32>
    %58 = vector.broadcast %19 : vector<1x32xf32> to vector<16x32xf32>
    %59 = arith.addf %57, %58 : vector<16x32xf32>
    %60 = vector.broadcast %18 : vector<1x32xf32> to vector<16x32xf32>
    %61 = arith.mulf %48, %60 : vector<16x32xf32>
    %62 = vector.broadcast %17 : vector<1x32xf32> to vector<16x32xf32>
    %63 = arith.mulf %52, %62 : vector<16x32xf32>
    %64 = arith.addf %61, %63 : vector<16x32xf32>
    %65 = vector.broadcast %20 : vector<1x32xf32> to vector<16x32xf32>
    %66 = arith.addf %64, %65 : vector<16x32xf32>
    %c0_31 = arith.constant 0 : index
    %c0_32 = arith.constant 0 : index
    %67 = vector.load %arg12[%c0_31, %c0_32] : memref<16x32xf32, #tpu.memory_space<vmem>>, vector<16x32xf32>
    tpu.vector_store %arg12[%c0_31, %c0_32], %59 {strides = array<i32>} : memref<16x32xf32, #tpu.memory_space<vmem>>, vector<16x32xf32>,
    %c0_33 = arith.constant 0 : index
    %c0_34 = arith.constant 0 : index
    %68 = vector.load %arg13[%c0_33, %c0_34] : memref<16x32xf32, #tpu.memory_space<vmem>>, vector<16x32xf32>
    tpu.vector_store %arg13[%c0_33, %c0_34], %66 {strides = array<i32>} : memref<16x32xf32, #tpu.memory_space<vmem>>, vector<16x32xf32>,
    return
  }
  func.func @transform_0(%arg0: i32) -> (i32, i32) {
    %c0_i32 = arith.constant 0 : i32
    %c0_i32_0 = arith.constant 0 : i32
    return %arg0, %c0_i32 : i32, i32
  }
  func.func @transform_1(%arg0: i32) -> (i32, i32) {
    %c0_i32 = arith.constant 0 : i32
    %c0_i32_0 = arith.constant 0 : i32
    return %arg0, %c0_i32 : i32, i32
  }
  func.func @transform_2(%arg0: i32) -> (i32, i32) {
    %c0_i32 = arith.constant 0 : i32
    %c0_i32_0 = arith.constant 0 : i32
    return %arg0, %c0_i32 : i32, i32
  }
  func.func @transform_3(%arg0: i32) -> (i32, i32) {
    %c0_i32 = arith.constant 0 : i32
    %c0_i32_0 = arith.constant 0 : i32
    return %arg0, %c0_i32 : i32, i32
  }
  func.func @transform_4(%arg0: i32) -> (i32, i32) {
    %c0_i32 = arith.constant 0 : i32
    %c0_i32_0 = arith.constant 0 : i32
    %c0_i32_1 = arith.constant 0 : i32
    return %c0_i32, %c0_i32_0 : i32, i32
  }
  func.func @transform_5(%arg0: i32) -> (i32, i32) {
    %c0_i32 = arith.constant 0 : i32
    %c0_i32_0 = arith.constant 0 : i32
    %c0_i32_1 = arith.constant 0 : i32
    return %c0_i32, %c0_i32_0 : i32, i32
  }
  func.func @transform_6(%arg0: i32) -> (i32, i32) {
    %c0_i32 = arith.constant 0 : i32
    %c0_i32_0 = arith.constant 0 : i32
    %c0_i32_1 = arith.constant 0 : i32
    return %c0_i32, %c0_i32_0 : i32, i32
  }
  func.func @transform_7(%arg0: i32) -> (i32, i32) {
    %c0_i32 = arith.constant 0 : i32
    %c0_i32_0 = arith.constant 0 : i32
    %c0_i32_1 = arith.constant 0 : i32
    return %c0_i32, %c0_i32_0 : i32, i32
  }
  func.func @transform_8(%arg0: i32) -> (i32, i32) {
    %c0_i32 = arith.constant 0 : i32
    %c0_i32_0 = arith.constant 0 : i32
    %c0_i32_1 = arith.constant 0 : i32
    return %c0_i32, %c0_i32_0 : i32, i32
  }
  func.func @transform_9(%arg0: i32) -> (i32, i32) {
    %c0_i32 = arith.constant 0 : i32
    %c0_i32_0 = arith.constant 0 : i32
    %c0_i32_1 = arith.constant 0 : i32
    return %c0_i32, %c0_i32_0 : i32, i32
  }
  func.func @transform_10(%arg0: i32) -> (i32, i32) {
    %c0_i32 = arith.constant 0 : i32
    %c0_i32_0 = arith.constant 0 : i32
    %c0_i32_1 = arith.constant 0 : i32
    return %c0_i32, %c0_i32_0 : i32, i32
  }
  func.func @transform_11(%arg0: i32) -> (i32, i32) {
    %c0_i32 = arith.constant 0 : i32
    %c0_i32_0 = arith.constant 0 : i32
    return %arg0, %c0_i32 : i32, i32
  }
  func.func @transform_12(%arg0: i32) -> (i32, i32) {
    %c0_i32 = arith.constant 0 : i32
    %c0_i32_0 = arith.constant 0 : i32
    return %arg0, %c0_i32 : i32, i32
  }
}

</mosaic_0001>

<bundles_post_ra>
// kernel: complex_encoder_block.4
= control target key start
LH: loop header
LB: loop body
LE: loop exit
PB: predicated region body
PF: predicated region fallthrough
CT: control target
= control target key end

     0   :  { %vm31_vm0 = vcmask 261120   ;;  %vm283_vm1 = vcmask 785408   ;;  %s465_s2 = inlined_call_operand.vmem [shape: f32[32,96], index: 2, kind: input, shape index: {}]   ;;  %s466_s3 = inlined_call_operand.vmem [shape: f32[32,96], index: 3, kind: input, shape index: {}]   ;;  %s467_s0 = inlined_call_operand.vmem [shape: f32[16,32], index: 0, kind: input, shape index: {}]   ;;  %s468_s1 = inlined_call_operand.vmem [shape: f32[16,32], index: 1, kind: input, shape index: {}]   ;;  %s469_s4 = inlined_call_operand.vmem [shape: f32[16,96], index: 4, kind: output, shape index: {0}]   ;;  %s470_s5 = inlined_call_operand.vmem [shape: f32[16,96], index: 5, kind: output, shape index: {1}]  }
   0x1   :  { %v23_v0 = vld [vmem:[%s465_s2] sm:$0xff]  ;;  %v24_v1 = vld [vmem:[%s465_s2 + $0x8] sm:$0xff]  ;;  %v25_v6 = vld [vmem:[%s465_s2 + $0x10] sm:$0xff] }
   0x2   :  { %v27_v2 = vld [vmem:[%s466_s3] sm:$0xff]  ;;  %v357_v3 = vpack.c.bf16 %v24_v1, %v23_v0  ;;  %v28_v4 = vld [vmem:[%s466_s3 + $0x8] sm:$0xff]  ;;  %v26_v7 = vld [vmem:[%s465_s2 + $0x18] sm:$0xff] }
   0x3   :  { %v196_v5 = vadd.f32 %v27_v2, %v23_v0  ;;  %v365_v8 = vpack.c.bf16 %v28_v4, %v27_v2  ;;  %v197_v9 = vadd.f32 %v28_v4, %v24_v1  ;;  %v361_v10 = vpack.c.bf16 %v26_v7, %v25_v6  ;;  %v29_v11 = vld [vmem:[%s466_s3 + $0x10] sm:$0xff]  ;;  %v30_v12 = vld [vmem:[%s466_s3 + $0x18] sm:$0xff]  ;;  %v19_v13 = vld [vmem:[%s467_s0] sm:$0xff] }
   0x4   :  { %358 = vmatprep.subr.bf16.mxu0 %v357_v3  ;;  %v369_v14 = vpack.c.bf16 %v30_v12, %v29_v11  ;;  %332 = vmatprep.mubr.msk.f32.mxu0 %vm31_vm0, %v19_v13  ;;  %v21_v15 = vld [vmem:[%s468_s1] sm:$0xff]  ;;  %v198_v17 = vadd.f32 %v29_v11, %v25_v6  ;;  %v199_v18 = vadd.f32 %v30_v12, %v26_v7  ;;  %v20_v19 = vld [vmem:[%s467_s0 + $0x8] sm:$0xff] }
   0x5   :  { %366 = vmatprep.subr.bf16.mxu1 %v365_v8  ;;  %360 = vmatpush3.bf16.msra.mxu0 %v357_v3  ;;  %v373_v16 = vpack.c.bf16 %v197_v9, %v196_v5  ;;  %v22_v20 = vld [vmem:[%s468_s1 + $0x8] sm:$0xff]  ;;  %v194_v21 = vadd.f32 %v21_v15, %v19_v13 }
   0x6   :  { %368 = vmatpush3.bf16.msra.mxu1 %v365_v8  ;;  %362 = vmatprep.subr.bf16.mxu0 %v361_v10  ;;  %v377_v22 = vpack.c.bf16 %v199_v18, %v198_v17  ;;  %v195_v23 = vadd.f32 %v22_v20, %v20_v19 }
   0x7   :  { %370 = vmatprep.subr.bf16.mxu1 %v369_v14  ;;  %343 = vmatprep.mubr.msk.f32.mxu1 %vm31_vm0, %v21_v15 }
   0x9   :  { %364 = vmatpush3.bf16.msra.mxu0 %v361_v10 }
   0xa   :  { %372 = vmatpush3.bf16.msra.mxu1 %v369_v14  ;;  %374 = vmatprep.subr.bf16.mxu0 %v373_v16 }
   0xc   :  { %333 = vmatmul.mubr.msk.f32.vlgmr.msra.gmra.mrb[0].mxu0 %vm31_vm0, %v20_v19 }
   0xd   :  { %344 = vmatmul.mubr.msk.f32.vlgmr.msra.gmra.mrb[0].mxu1 %vm31_vm0, %v22_v20  ;;  %376 = vmatpush3.bf16.msra.mxu0 %v373_v16 }
   0xe   :  { %378 = vmatprep.subr.bf16.mxu0 %v377_v22  ;;  %354 = vmatprep.mubr.msk.f32.mxu0 %vm31_vm0, %v194_v21 }
  0x11   :  { %380 = vmatpush3.bf16.msra.mxu0 %v377_v22 }
  0x14   :  { %355 = vmatmul.mubr.msk.f32.vlgmr.msra.gmra.mrb[2].mxu0 %vm31_vm0, %v195_v23 }
  0xdf   :  { %v334_v24 = vpop.f32.mrb[0].mxu0 }
  0xe0   :  { %v345_v25 = vpop.f32.mrb[0].mxu1  ;;  %v104_v26 = vpop.f32.mrb[1].mxu0 }
  0xe1   :  { %v282_v27 = vsub.f32 %v334_v24, %v345_v25  ;;  %v185_v28 = vpop.f32.mrb[1].mxu1 }
  0xe2   :  { %v281_v29 = vsub.f32 %v104_v26, %v185_v28 }
  0xe3   :  { %285 = vst.msk [vmem:[%s469_s4 + $0x8] sm:$0xff] %vm283_vm1, %v282_v27 }
  0xe4   :  { %284 = vst.msk [vmem:[%s469_s4] sm:$0xff] %vm283_vm1, %v281_v29 }
  0xe7   :  { %v356_v30 = vpop.f32.mrb[2].mxu0 }
  0xe8   :  { %v287_v31 = vsub.f32 %v356_v30, %v334_v24  ;;  %v272_v32 = vpop.f32.mrb[3].mxu0 }
  0xe9   :  { %v286_v33 = vsub.f32 %v272_v32, %v104_v26 }
  0xea   :  { %v289_v34 = vsub.f32 %v287_v31, %v345_v25 }
  0xeb   :  { %v288_v35 = vsub.f32 %v286_v33, %v185_v28 }
  0xec   :  { %291 = vst.msk [vmem:[%s470_s5 + $0x8] sm:$0xff] %vm283_vm1, %v289_v34 }
  0xed   :  { %290 = vst.msk [vmem:[%s470_s5] sm:$0xff] %vm283_vm1, %v288_v35 }

// kernel: complex_encoder_block.6
= control target key start
LH: loop header
LB: loop body
LE: loop exit
PB: predicated region body
PF: predicated region fallthrough
CT: control target
= control target key end

     0   :  { %vm52_vm0 = vcmask 261120   ;;  %s677_s4 = inlined_call_operand.vmem [shape: f32[32,32], index: 4, kind: input, shape index: {}]   ;;  %s678_s5 = inlined_call_operand.vmem [shape: f32[32,32], index: 5, kind: input, shape index: {}]   ;;  %s679_s0 = inlined_call_operand.vmem [shape: f32[16,32], index: 0, kind: input, shape index: {}]   ;;  %s680_s1 = inlined_call_operand.vmem [shape: f32[16,32], index: 1, kind: input, shape index: {}]   ;;  %s681_s2 = inlined_call_operand.vmem [shape: f32[16,32], index: 2, kind: input, shape index: {}]   ;;  %s682_s3 = inlined_call_operand.vmem [shape: f32[16,32], index: 3, kind: input, shape index: {}]   ;;  %s683_s6 = inlined_call_operand.vmem [shape: f32[1,32], index: 6, kind: input, shape index: {}]   ;;  %s684_s7 = inlined_call_operand.vmem [shape: f32[1,32], index: 7, kind: input, shape index: {}]   ;;  %s685_s8 = inlined_call_operand.vmem [shape: f32[1,32], index: 8, kind: input, shape index: {}]   ;;  %s686_s9 = inlined_call_operand.vmem [shape: f32[1,32], index: 9, kind: input, shape index: {}]   ;;  %s687_s10 = inlined_call_operand.vmem [shape: f32[1,32], index: 10, kind: input, shape index: {}]   ;;  %s688_s11 = inlined_call_operand.vmem [shape: f32[16,32], index: 11, kind: output, shape index: {0}]   ;;  %s689_s12 = inlined_call_operand.vmem [shape: f32[16,32], index: 12, kind: output, shape index: {1}]  }
   0x1   :  { %v44_v0 = vld [vmem:[%s677_s4] sm:$0xff]  ;;  %v45_v1 = vld [vmem:[%s677_s4 + $0x8] sm:$0xff]  ;;  %v46_v6 = vld [vmem:[%s677_s4 + $0x10] sm:$0xff] }
   0x2   :  { %v48_v2 = vld [vmem:[%s678_s5] sm:$0xff]  ;;  %v491_v3 = vpack.c.bf16 %v45_v1, %v44_v0  ;;  %v49_v4 = vld [vmem:[%s678_s5 + $0x8] sm:$0xff]  ;;  %v47_v7 = vld [vmem:[%s677_s4 + $0x18] sm:$0xff] }
   0x3   :  { %v217_v5 = vadd.f32 %v48_v2, %v44_v0  ;;  %v499_v8 = vpack.c.bf16 %v49_v4, %v48_v2  ;;  %v218_v9 = vadd.f32 %v49_v4, %v45_v1  ;;  %v495_v10 = vpack.c.bf16 %v47_v7, %v46_v6  ;;  %v50_v11 = vld [vmem:[%s678_s5 + $0x10] sm:$0xff]  ;;  %v51_v12 = vld [vmem:[%s678_s5 + $0x18] sm:$0xff]  ;;  %v40_v13 = vld [vmem:[%s679_s0] sm:$0xff] }
   0x4   :  { %492 = vmatprep.subr.bf16.mxu0 %v491_v3  ;;  %v503_v14 = vpack.c.bf16 %v51_v12, %v50_v11  ;;  %466 = vmatprep.mubr.msk.f32.mxu0 %vm52_vm0, %v40_v13  ;;  %v42_v15 = vld [vmem:[%s680_s1] sm:$0xff]  ;;  %v219_v17 = vadd.f32 %v50_v11, %v46_v6  ;;  %v220_v18 = vadd.f32 %v51_v12, %v47_v7  ;;  %v41_v19 = vld [vmem:[%s679_s0 + $0x8] sm:$0xff] }
   0x5   :  { %500 = vmatprep.subr.bf16.mxu1 %v499_v8  ;;  %494 = vmatpush3.bf16.msra.mxu0 %v491_v3  ;;  %v507_v16 = vpack.c.bf16 %v218_v9, %v217_v5  ;;  %v43_v20 = vld [vmem:[%s680_s1 + $0x8] sm:$0xff]  ;;  %v215_v21 = vadd.f32 %v42_v15, %v40_v13  ;;  %v308_v29 = vld [vmem:[%s681_s2] sm:$0xff] }
   0x6   :  { %502 = vmatpush3.bf16.msra.mxu1 %v499_v8  ;;  %496 = vmatprep.subr.bf16.mxu0 %v495_v10  ;;  %v511_v22 = vpack.c.bf16 %v220_v18, %v219_v17  ;;  %v216_v23 = vadd.f32 %v43_v20, %v41_v19  ;;  %v309_v31 = vld [vmem:[%s681_s2 + $0x8] sm:$0xff]  ;;  %v312_v41 = vld [vmem:[%s682_s3] sm:$0xff] }
   0x7   :  { %504 = vmatprep.subr.bf16.mxu1 %v503_v14  ;;  %477 = vmatprep.mubr.msk.f32.mxu1 %vm52_vm0, %v42_v15  ;;  %v313_v43 = vld [vmem:[%s682_s3 + $0x8] sm:$0xff]  ;;  %v435_v15 = vld [vmem:[%s683_s6] ss:$0 sm:$0xff] }
   0x8   :  { %v436_v17 = vld [vmem:[%s685_s8] ss:$0 sm:$0xff] }
   0x9   :  { %498 = vmatpush3.bf16.msra.mxu0 %v495_v10 }
   0xa   :  { %506 = vmatpush3.bf16.msra.mxu1 %v503_v14  ;;  %508 = vmatprep.subr.bf16.mxu0 %v507_v16 }
   0xc   :  { %467 = vmatmul.mubr.msk.f32.vlgmr.msra.gmra.mrb[0].mxu0 %vm52_vm0, %v41_v19 }
   0xd   :  { %478 = vmatmul.mubr.msk.f32.vlgmr.msra.gmra.mrb[0].mxu1 %vm52_vm0, %v43_v20  ;;  %510 = vmatpush3.bf16.msra.mxu0 %v507_v16  ;;  %v438_v16 = vld [vmem:[%s684_s7] ss:$0 sm:$0xff] }
   0xe   :  { %512 = vmatprep.subr.bf16.mxu0 %v511_v22  ;;  %488 = vmatprep.mubr.msk.f32.mxu0 %vm52_vm0, %v215_v21 }
  0x11   :  { %514 = vmatpush3.bf16.msra.mxu0 %v511_v22 }
  0x14   :  { %489 = vmatmul.mubr.msk.f32.vlgmr.msra.gmra.mrb[2].mxu0 %vm52_vm0, %v216_v23 }
  0xdf   :  { %v468_v24 = vpop.f32.mrb[0].mxu0 }
  0xe0   :  { %v479_v25 = vpop.f32.mrb[0].mxu1  ;;  %v125_v26 = vpop.f32.mrb[1].mxu0 }
  0xe1   :  { %v303_v27 = vsub.f32 %v468_v24, %v479_v25  ;;  %v206_v28 = vpop.f32.mrb[1].mxu1 }
  0xe2   :  { %v302_v30 = vsub.f32 %v125_v26, %v206_v28 }
  0xe3   :  { %v311_v34 = vadd.f32 %v309_v31, %v303_v27 }
  0xe4   :  { %v310_v32 = vadd.f32 %v308_v29, %v302_v30 }
  0xe5   :  { %v324_v40 = vsel %vm52_vm0, %v311_v34, 0.0 }
  0xe6   :  { %v321_v33 = vsel %vm52_vm0, %v310_v32, 0.0 }
  0xe7   :  { %322 = vadd.xlane.f32.xlu0 %v321_v33  ;;  %v490_v35 = vpop.f32.mrb[2].mxu0 }
  0xe8   :  { %v305_v36 = vsub.f32 %v490_v35, %v468_v24  ;;  %v293_v37 = vpop.f32.mrb[3].mxu0 }
  0xe9   :  { %v304_v38 = vsub.f32 %v293_v37, %v125_v26  ;;  %v439_v26 = vld [vmem:[%s687_s10] ss:$0 sm:$0xff] }
  0xea   :  { %v307_v39 = vsub.f32 %v305_v36, %v479_v25  ;;  %v437_v25 = vld [vmem:[%s686_s9] ss:$0 sm:$0xff] }
  0xeb   :  { %v306_v42 = vsub.f32 %v304_v38, %v206_v28  ;;  %325 = vadd.xlane.f32.xlu0 %v324_v40 }
  0xec   :  { %v315_v46 = vadd.f32 %v313_v43, %v307_v39 }
  0xed   :  { %v314_v44 = vadd.f32 %v312_v41, %v306_v42 }
  0xee   :  { %v333_v47 = vsel %vm52_vm0, %v315_v46, 0.0 }
  0xef   :  { %v330_v45 = vsel %vm52_vm0, %v314_v44, 0.0 }
  0xf0   :  { %331 = vadd.xlane.f32.xlu1 %v330_v45 }
  0xf4   :  { %334 = vadd.xlane.f32.xlu1 %v333_v47 }
 0x174   :  { %v323_v48 = vpop.xlane.xlu0 %322 }
 0x175   :  { %v328_v49 = vmul.f32 0.03125, %v323_v48 }
 0x177   :  { %v338_v50 = vsub.f32 %v310_v32, %v328_v49 }
 0x178   :  { %v326_v51 = vpop.xlane.xlu0 %325 }
 0x179   :  { %v329_v52 = vmul.f32 0.03125, %v326_v51  ;;  %v340_v53 = vmul.f32 %v338_v50, %v338_v50 }
 0x17b   :  { %v339_v54 = vsub.f32 %v311_v34, %v329_v52  ;;  %v342_v55 = vsel %vm52_vm0, %v340_v53, 0.0 }
 0x17c   :  { %343 = vadd.xlane.f32.xlu0 %v342_v55 }
 0x17d   :  { %v332_v56 = vpop.xlane.xlu1 %331  ;;  %v341_v57 = vmul.f32 %v339_v54, %v339_v54 }
 0x17e   :  { %v336_v58 = vmul.f32 0.03125, %v332_v56 }
 0x17f   :  { %v345_v59 = vsel %vm52_vm0, %v341_v57, 0.0 }
 0x180   :  { %v348_v60 = vsub.f32 %v314_v44, %v336_v58  ;;  %346 = vadd.xlane.f32.xlu1 %v345_v59 }
 0x181   :  { %v335_v61 = vpop.xlane.xlu1 %334 }
 0x182   :  { %v337_v62 = vmul.f32 0.03125, %v335_v61  ;;  %v350_v63 = vmul.f32 %v348_v60, %v348_v60 }
 0x184   :  { %v349_v0 = vsub.f32 %v315_v46, %v337_v62  ;;  %v352_v1 = vsel %vm52_vm0, %v350_v63, 0.0 }
 0x185   :  { %353 = vadd.xlane.f32.xlu0 %v352_v1 }
 0x186   :  { %v351_v2 = vmul.f32 %v349_v0, %v349_v0 }
 0x188   :  { %v355_v3 = vsel %vm52_vm0, %v351_v2, 0.0 }
 0x189   :  { %356 = vadd.xlane.f32.xlu1 %v355_v3 }
 0x209   :  { %v344_v4 = vpop.xlane.xlu0 %343 }
 0x20d   :  { %v347_v5 = vpop.xlane.xlu1 %346 }
 0x212   :  { %v354_v6 = vpop.xlane.xlu0 %353 }
 0x213   :  { %v358_v7 = vadd.f32 %v354_v6, %v344_v4 }
 0x215   :  { %v361_v8 = vmul.f32 0.032258064, %v358_v7 }
 0x216   :  { %v357_v9 = vpop.xlane.xlu1 %356 }
 0x217   :  { %v363_v10 = vadd.f32 1e-09, %v361_v8  ;;  %v359_v11 = vadd.f32 %v357_v9, %v347_v5 }
 0x219   :  { %515 = vrsqrt.f32 %v363_v10  ;;  %v362_v12 = vmul.f32 0.032258064, %v359_v11 }
 0x21b   :  { %v364_v13 = vadd.f32 1e-09, %v362_v12 }
 0x21d   :  { %517 = vrsqrt.f32 %v364_v13 }
 0x223   :  { %v516_v14 = vpop.eup %515 }
 0x224   :  { %v367_v18 = vmul.f32 %v516_v14, %v338_v50  ;;  %v369_v19 = vmul.f32 %v516_v14, %v348_v60 }
 0x226   :  { %v377_v20 = vmul.f32 %v435_v15, %v367_v18  ;;  %v385_v21 = vmul.f32 %v436_v17, %v369_v19  ;;  %v397_v22 = vmul.f32 %v436_v17, %v367_v18  ;;  %v405_v23 = vmul.f32 %v438_v16, %v369_v19 }
 0x227   :  { %v518_v24 = vpop.eup %517 }
 0x228   :  { %v387_v27 = vadd.f32 %v385_v21, %v377_v20  ;;  %v407_v28 = vadd.f32 %v405_v23, %v397_v22  ;;  %v368_v29 = vmul.f32 %v518_v24, %v339_v54  ;;  %v370_v30 = vmul.f32 %v518_v24, %v349_v0 }
 0x22a   :  { %v395_v31 = vadd.f32 %v437_v25, %v387_v27  ;;  %v415_v32 = vadd.f32 %v439_v26, %v407_v28  ;;  %v378_v33 = vmul.f32 %v435_v15, %v368_v29  ;;  %v386_v34 = vmul.f32 %v436_v17, %v370_v30 }
 0x22b   :  { %v398_v35 = vmul.f32 %v436_v17, %v368_v29  ;;  %v406_v36 = vmul.f32 %v438_v16, %v370_v30 }
 0x22c   :  { %417 = vst.msk [vmem:[%s688_s11] sm:$0xff] %vm52_vm0, %v395_v31  ;;  %419 = vst.msk [vmem:[%s689_s12] sm:$0xff] %vm52_vm0, %v415_v32  ;;  %v388_v37 = vadd.f32 %v386_v34, %v378_v33 }
 0x22d   :  { %v408_v38 = vadd.f32 %v406_v36, %v398_v35 }
 0x22e   :  { %v396_v39 = vadd.f32 %v437_v25, %v388_v37 }
 0x22f   :  { %v416_v40 = vadd.f32 %v439_v26, %v408_v38 }
 0x230   :  { %418 = vst.msk [vmem:[%s688_s11 + $0x8] sm:$0xff] %vm52_vm0, %v396_v39 }
 0x231   :  { %420 = vst.msk [vmem:[%s689_s12 + $0x8] sm:$0xff] %vm52_vm0, %v416_v40 }

// kernel: complex_encoder_block.7
= control target key start
LH: loop header
LB: loop body
LE: loop exit
PB: predicated region body
PF: predicated region fallthrough
CT: control target
= control target key end

     0   :  { %vm66_vm0 = vcmask 261120   ;;  %v320_v42 = vlaneseq  ;;  %s1197_s2 = inlined_call_operand.vmem [shape: f32[32,32], index: 2, kind: input, shape index: {}]   ;;  %s1198_s3 = inlined_call_operand.vmem [shape: f32[32,32], index: 3, kind: input, shape index: {}]   ;;  %s1199_s0 = inlined_call_operand.vmem [shape: f32[16,32], index: 0, kind: input, shape index: {}]   ;;  %s1200_s1 = inlined_call_operand.vmem [shape: f32[16,32], index: 1, kind: input, shape index: {}]   ;;  %s1201_s6 = inlined_call_operand.vmem [shape: f32[32,32], index: 6, kind: input, shape index: {}]   ;;  %s1202_s7 = inlined_call_operand.vmem [shape: f32[32,32], index: 7, kind: input, shape index: {}]   ;;  %s1203_s4 = inlined_call_operand.vmem [shape: f32[1,32], index: 4, kind: input, shape index: {}]   ;;  %s1204_s5 = inlined_call_operand.vmem [shape: f32[1,32], index: 5, kind: input, shape index: {}]   ;;  %s1205_s8 = inlined_call_operand.vmem [shape: f32[1,32], index: 8, kind: input, shape index: {}]   ;;  %s1206_s9 = inlined_call_operand.vmem [shape: f32[1,32], index: 9, kind: input, shape index: {}]   ;;  %s1207_s10 = inlined_call_operand.vmem [shape: f32[1,32], index: 10, kind: input, shape index: {}]   ;;  %s1208_s11 = inlined_call_operand.vmem [shape: f32[1,32], index: 11, kind: input, shape index: {}]   ;;  %s1209_s12 = inlined_call_operand.vmem [shape: f32[1,32], index: 12, kind: input, shape index: {}]   ;;  %s1210_s13 = inlined_call_operand.vmem [shape: f32[1,32], index: 13, kind: input, shape index: {}]   ;;  %s1211_s14 = inlined_call_operand.vmem [shape: f32[1,32], index: 14, kind: input, shape index: {}]   ;;  %s1212_s15 = inlined_call_operand.vmem [shape: f32[16,32], index: 15, kind: output, shape index: {0}]   ;;  %s1213_s16 = inlined_call_operand.vmem [shape: f32[16,32], index: 16, kind: output, shape index: {1}]  }
   0x1   :  { %1215 = sst [smem:[#allocation2_spill]] %s1197_s2  ;;  %v60_v2 = vld [vmem:[%s1198_s3] sm:$0xff]  ;;  %v61_v4 = vld [vmem:[%s1198_s3 + $0x8] sm:$0xff]  ;;  %v62_v11 = vld [vmem:[%s1198_s3 + $0x10] sm:$0xff] }
   0x2   :  { %s1216_s23 = sld [smem:[#allocation2_spill]]  ;;  %v899_v8 = vpack.c.bf16 %v61_v4, %v60_v2  ;;  %v63_v12 = vld [vmem:[%s1198_s3 + $0x18] sm:$0xff]  ;;  %v1071_v13 = vld [vmem:[%s1199_s0] sm:$0xff]  ;;  %v1085_v19 = vld [vmem:[%s1199_s0 + $0x8] sm:$0xff]  ;;  %v321_v43 = vshrl.u32 %v320_v42, 7 }
   0x3   :  { %v903_v14 = vpack.c.bf16 %v63_v12, %v62_v11  ;;  %833 = vmatprep.mubr.msk.f32.mxu0 %vm66_vm0, %v1071_v13  ;;  %v1078_v15 = vld [vmem:[%s1200_s1] sm:$0xff]  ;;  %v1092_v21 = vld [vmem:[%s1200_s1 + $0x8] sm:$0xff]  ;;  %v370_v27 = vld [vmem:[%s1201_s6 + $0x10] sm:$0xff] }
   0x4   :  { %900 = vmatprep.subr.bf16.mxu1 %v899_v8  ;;  %844 = vmatprep.mubr.msk.f32.mxu1 %vm66_vm0, %v1078_v15  ;;  %v229_v20 = vadd.f32 %v1078_v15, %v1071_v13  ;;  %v230_v23 = vadd.f32 %v1092_v21, %v1085_v19  ;;  %v368_v24 = vld [vmem:[%s1201_s6] sm:$0xff]  ;;  %v369_v25 = vld [vmem:[%s1201_s6 + $0x8] sm:$0xff]  ;;  %v371_v28 = vld [vmem:[%s1201_s6 + $0x18] sm:$0xff]  ;;  %v1135_v47 = vsub.s32 0, %v321_v43 }
   0x5   :  { %902 = vmatpush3.bf16.msra.mxu1 %v899_v8  ;;  %v915_v26 = vpack.c.bf16 %v369_v25, %v368_v24  ;;  %v919_v29 = vpack.c.bf16 %v371_v28, %v370_v27  ;;  %v372_v30 = vld [vmem:[%s1202_s7] sm:$0xff]  ;;  %v373_v31 = vld [vmem:[%s1202_s7 + $0x8] sm:$0xff]  ;;  %v374_v36 = vld [vmem:[%s1202_s7 + $0x10] sm:$0xff] }
   0x6   :  { %904 = vmatprep.subr.bf16.mxu1 %v903_v14  ;;  %v923_v32 = vpack.c.bf16 %v373_v31, %v372_v30  ;;  %v542_v33 = vadd.f32 %v372_v30, %v368_v24  ;;  %v543_v34 = vadd.f32 %v373_v31, %v369_v25  ;;  %v375_v37 = vld [vmem:[%s1202_s7 + $0x18] sm:$0xff]  ;;  %v544_v39 = vadd.f32 %v374_v36, %v370_v27  ;;  %v64_v44 = vld [vmem:[%s1203_s4] sm:$0x1] }
   0x7   :  { %v927_v38 = vpack.c.bf16 %v375_v37, %v374_v36  ;;  %v545_v40 = vadd.f32 %v375_v37, %v371_v28  ;;  %v65_v45 = vld [vmem:[%s1204_s5] sm:$0x1] }
   0x8   :  { %v56_v0 = vld [vmem:[%s1216_s23] sm:$0xff]  ;;  %v57_v1 = vld [vmem:[%s1216_s23 + $0x8] sm:$0xff]  ;;  %v58_v6 = vld [vmem:[%s1216_s23 + $0x10] sm:$0xff]  ;;  %v1120_v35 = vpack.c.bf16 %v543_v34, %v542_v33  ;;  %v318_v46 = vsub.f32 %v64_v44, %v65_v45  ;;  %v331_v57 = vadd.f32 %v65_v45, %v64_v44 }
   0x9   :  { %v891_v3 = vpack.c.bf16 %v57_v1, %v56_v0  ;;  %v231_v5 = vadd.f32 %v60_v2, %v56_v0  ;;  %v59_v7 = vld [vmem:[%s1216_s23 + $0x18] sm:$0xff]  ;;  %v232_v9 = vadd.f32 %v61_v4, %v57_v1  ;;  %v233_v17 = vadd.f32 %v62_v11, %v58_v6  ;;  %906 = vmatpush3.bf16.msra.mxu1 %v903_v14  ;;  %v376_v31 = vld [vmem:[%s1205_s8] sm:$0x1] }
   0xa   :  { %v895_v10 = vpack.c.bf16 %v59_v7, %v58_v6  ;;  %v234_v18 = vadd.f32 %v63_v12, %v59_v7  ;;  %916 = vmatprep.subr.bf16.mxu1 %v915_v26  ;;  %v935_v41 = vpack.c.bf16 %v545_v40, %v544_v39  ;;  %v323_v49 = vrot.slane %v318_v46, %v1135_v47 }
   0xb   :  { %892 = vmatprep.subr.bf16.mxu0 %v891_v3  ;;  %v907_v16 = vpack.c.bf16 %v232_v9, %v231_v5  ;;  %v336_v62 = vrot.slane %v331_v57, %v1135_v47 }
   0xc   :  { %894 = vmatpush3.bf16.msra.mxu0 %v891_v3  ;;  %v911_v22 = vpack.c.bf16 %v234_v18, %v233_v17  ;;  %845 = vmatmul.mubr.msk.f32.vlgmr.msra.gmra.mrb[0].mxu1 %vm66_vm0, %v1092_v21 }
   0xd   :  { %896 = vmatprep.subr.bf16.mxu0 %v895_v10  ;;  %918 = vmatpush3.bf16.msra.mxu1 %v915_v26 }
   0xe   :  { %920 = vmatprep.subr.bf16.mxu1 %v919_v29 }
  0x10   :  { %898 = vmatpush3.bf16.msra.mxu0 %v895_v10 }
  0x11   :  { %908 = vmatprep.subr.bf16.mxu0 %v907_v16  ;;  %922 = vmatpush3.bf16.msra.mxu1 %v919_v29 }
  0x12   :  { %932 = vmatprep.subr.bf16.mxu1 %v1120_v35 }
  0x13   :  { %834 = vmatmul.mubr.msk.f32.vlgmr.msra.gmra.mrb[0].mxu0 %vm66_vm0, %v1085_v19 }
  0x14   :  { %910 = vmatpush3.bf16.msra.mxu0 %v907_v16  ;;  %855 = vmatprep.mubr.msk.f32.mxu0 %vm66_vm0, %v229_v20 }
  0x15   :  { %912 = vmatprep.subr.bf16.mxu0 %v911_v22 }
  0x18   :  { %914 = vmatpush3.bf16.msra.mxu0 %v911_v22 }
  0x19   :  { %924 = vmatprep.subr.bf16.mxu0 %v923_v32 }
  0x1b   :  { %856 = vmatmul.mubr.msk.f32.vlgmr.msra.gmra.mrb[2].mxu0 %vm66_vm0, %v230_v23 }
  0x1c   :  { %926 = vmatpush3.bf16.msra.mxu0 %v923_v32  ;;  %v377_v32 = vld [vmem:[%s1206_s9] sm:$0x1] }
  0x1d   :  { %928 = vmatprep.subr.bf16.mxu0 %v927_v38  ;;  %v629_v33 = vsub.f32 %v376_v31, %v377_v32  ;;  %v642_v36 = vadd.f32 %v377_v32, %v376_v31 }
  0x1f   :  { %v647_v46 = vrot.slane %v642_v36, %v1135_v47  ;;  %v786_v36 = vld [vmem:[%s1210_s13] ss:$0 sm:$0xff] }
  0x20   :  { %930 = vmatpush3.bf16.msra.mxu0 %v927_v38 }
  0xdf   :  { %v846_v50 = vpop.f32.mrb[0].mxu1 }
  0xe0   :  { %v220_v53 = vpop.f32.mrb[1].mxu1 }
  0xe6   :  { %v835_v48 = vpop.f32.mrb[0].mxu0 }
  0xe7   :  { %v139_v51 = vpop.f32.mrb[1].mxu0  ;;  %v317_v52 = vsub.f32 %v835_v48, %v846_v50 }
  0xe8   :  { %v316_v54 = vsub.f32 %v139_v51, %v220_v53 }
  0xe9   :  { %v326_v55 = vadd.f32 %v323_v49, %v317_v52 }
  0xea   :  { %v325_v56 = vadd.f32 %v323_v49, %v316_v54 }
  0xeb   :  { %v775_v58 = vmul.f32 -1.442695, %v326_v55 }
  0xec   :  { %v774_v59 = vmul.f32 -1.442695, %v325_v56 }
  0xed   :  { %939 = vpow2.f32 %v775_v58 }
  0xee   :  { %v857_v60 = vpop.f32.mrb[2].mxu0  ;;  %941 = vpow2.f32 %v774_v59 }
  0xef   :  { %v328_v61 = vsub.f32 %v857_v60, %v835_v48  ;;  %v307_v63 = vpop.f32.mrb[3].mxu0 }
  0xf0   :  { %v327_v0 = vsub.f32 %v307_v63, %v139_v51 }
  0xf1   :  { %v330_v1 = vsub.f32 %v328_v61, %v846_v50 }
  0xf2   :  { %v329_v2 = vsub.f32 %v327_v0, %v220_v53 }
  0xf3   :  { %v339_v3 = vadd.f32 %v336_v62, %v330_v1 }
  0xf4   :  { %v338_v4 = vadd.f32 %v336_v62, %v329_v2 }
  0xf5   :  { %v777_v5 = vmul.f32 -1.442695, %v339_v3 }
  0xf6   :  { %v776_v6 = vmul.f32 -1.442695, %v338_v4 }
  0xf7   :  { %943 = vpow2.f32 %v777_v5  ;;  %v940_v7 = vpop.eup %939 }
  0xf8   :  { %945 = vpow2.f32 %v776_v6  ;;  %v942_v8 = vpop.eup %941  ;;  %v347_v9 = vadd.f32 1.0, %v940_v7 }
  0xf9   :  { %v346_v10 = vadd.f32 1.0, %v942_v8 }
  0xfa   :  { %947 = vrcp.f32 %v347_v9 }
  0xfb   :  { %949 = vrcp.f32 %v346_v10 }
 0x101   :  { %v944_v11 = vpop.eup %943 }
 0x102   :  { %v946_v12 = vpop.eup %945  ;;  %v361_v14 = vadd.f32 1.0, %v944_v11 }
 0x103   :  { %v360_v16 = vadd.f32 1.0, %v946_v12 }
 0x104   :  { %951 = vrcp.f32 %v361_v14  ;;  %v948_v17 = vpop.eup %947 }
 0x105   :  { %953 = vrcp.f32 %v360_v16  ;;  %v950_v18 = vpop.eup %949  ;;  %v353_v22 = vmul.f32 %v948_v17, %v326_v55 }
 0x106   :  { %v352_v20 = vmul.f32 %v950_v18, %v325_v56 }
 0x108   :  { %866 = vmatprep.mubr.msk.f32.mxu1 %vm66_vm0, %v352_v20 }
 0x109   :  { %867 = vmatmul.mubr.msk.f32.vlgmr.msra.gmra.mrb[2].mxu1 %vm66_vm0, %v353_v22 }
 0x10a   :  { %934 = vmatpush3.bf16.msra.mxu1 %v1120_v35  ;;  %v634_v35 = vrot.slane %v629_v33, %v1135_v47 }
 0x10b   :  { %936 = vmatprep.subr.bf16.mxu1 %v935_v41 }
 0x10e   :  { %v952_v23 = vpop.eup %951  ;;  %938 = vmatpush3.bf16.msra.mxu1 %v935_v41 }
 0x10f   :  { %v954_v24 = vpop.eup %953  ;;  %v367_v25 = vmul.f32 %v952_v23, %v339_v3 }
 0x110   :  { %v366_v26 = vmul.f32 %v954_v24, %v338_v4 }
 0x111   :  { %v541_v27 = vadd.f32 %v367_v25, %v353_v22 }
 0x112   :  { %877 = vmatprep.mubr.msk.f32.mxu0 %vm66_vm0, %v366_v26  ;;  %v540_v28 = vadd.f32 %v366_v26, %v352_v20  ;;  %v784_v26 = vld [vmem:[%s1207_s10] ss:$0 sm:$0xff] }
 0x113   :  { %878 = vmatmul.mubr.msk.f32.vlgmr.msra.gmra.mrb[4].mxu0 %vm66_vm0, %v367_v25 }
 0x114   :  { %888 = vmatprep.mubr.msk.f32.mxu1 %vm66_vm0, %v540_v28  ;;  %v785_v28 = vld [vmem:[%s1209_s12] ss:$0 sm:$0xff] }
 0x115   :  { %889 = vmatmul.mubr.msk.f32.vlgmr.msra.gmra.mrb[4].mxu1 %vm66_vm0, %v541_v27  ;;  %v787_v27 = vld [vmem:[%s1208_s11] ss:$0 sm:$0xff] }
 0x1dc   :  { %v868_v29 = vpop.f32.mrb[2].mxu1 }
 0x1dd   :  { %v450_v30 = vpop.f32.mrb[3].mxu1 }
 0x1e6   :  { %v879_v34 = vpop.f32.mrb[4].mxu0 }
 0x1e7   :  { %v628_v37 = vsub.f32 %v868_v29, %v879_v34  ;;  %v531_v38 = vpop.f32.mrb[5].mxu0 }
 0x1e8   :  { %v627_v39 = vsub.f32 %v450_v30, %v531_v38  ;;  %v890_v40 = vpop.f32.mrb[4].mxu1 }
 0x1e9   :  { %v639_v41 = vsub.f32 %v890_v40, %v868_v29  ;;  %v618_v42 = vpop.f32.mrb[5].mxu1  ;;  %v637_v43 = vadd.f32 %v634_v35, %v628_v37  ;;  %v788_v37 = vld [vmem:[%s1211_s14] ss:$0 sm:$0xff] }
 0x1ea   :  { %v636_v44 = vadd.f32 %v634_v35, %v627_v39  ;;  %v638_v45 = vsub.f32 %v618_v42, %v450_v30 }
 0x1eb   :  { %v641_v48 = vsub.f32 %v639_v41, %v879_v34  ;;  %v652_v53 = vadd.f32 %v637_v43, %v1085_v19 }
 0x1ec   :  { %v640_v49 = vsub.f32 %v638_v45, %v531_v38  ;;  %v651_v50 = vadd.f32 %v636_v44, %v1071_v13 }
 0x1ed   :  { %v650_v54 = vadd.f32 %v647_v46, %v641_v48  ;;  %v663_v57 = vsel %vm66_vm0, %v652_v53, 0.0 }
 0x1ee   :  { %v660_v51 = vsel %vm66_vm0, %v651_v50, 0.0  ;;  %v649_v52 = vadd.f32 %v647_v46, %v640_v49 }
 0x1ef   :  { %661 = vadd.xlane.f32.xlu0 %v660_v51  ;;  %v654_v58 = vadd.f32 %v650_v54, %v1092_v21 }
 0x1f0   :  { %v653_v55 = vadd.f32 %v649_v52, %v1078_v15 }
 0x1f1   :  { %v672_v47 = vsel %vm66_vm0, %v654_v58, 0.0 }
 0x1f2   :  { %v669_v56 = vsel %vm66_vm0, %v653_v55, 0.0 }
 0x1f3   :  { %670 = vadd.xlane.f32.xlu1 %v669_v56  ;;  %664 = vadd.xlane.f32.xlu0 %v663_v57 }
 0x1f7   :  { %673 = vadd.xlane.f32.xlu1 %v672_v47 }
 0x27c   :  { %v662_v13 = vpop.xlane.xlu0 %661 }
 0x27d   :  { %v667_v59 = vmul.f32 0.03125, %v662_v13 }
 0x27f   :  { %v677_v60 = vsub.f32 %v651_v50, %v667_v59 }
 0x280   :  { %v671_v61 = vpop.xlane.xlu1 %670  ;;  %v665_v19 = vpop.xlane.xlu0 %664 }
 0x281   :  { %v675_v62 = vmul.f32 0.03125, %v671_v61  ;;  %v668_v63 = vmul.f32 0.03125, %v665_v19  ;;  %v679_v0 = vmul.f32 %v677_v60, %v677_v60 }
 0x283   :  { %v687_v15 = vsub.f32 %v653_v55, %v675_v62  ;;  %v678_v1 = vsub.f32 %v652_v53, %v668_v63  ;;  %v681_v2 = vsel %vm66_vm0, %v679_v0, 0.0 }
 0x284   :  { %v674_v3 = vpop.xlane.xlu1 %673  ;;  %682 = vadd.xlane.f32.xlu0 %v681_v2 }
 0x285   :  { %v676_v21 = vmul.f32 0.03125, %v674_v3  ;;  %v689_v4 = vmul.f32 %v687_v15, %v687_v15  ;;  %v680_v5 = vmul.f32 %v678_v1, %v678_v1 }
 0x287   :  { %v688_v6 = vsub.f32 %v654_v58, %v676_v21  ;;  %v691_v7 = vsel %vm66_vm0, %v689_v4, 0.0  ;;  %v684_v8 = vsel %vm66_vm0, %v680_v5, 0.0 }
 0x288   :  { %692 = vadd.xlane.f32.xlu0 %v691_v7  ;;  %685 = vadd.xlane.f32.xlu1 %v684_v8 }
 0x289   :  { %v690_v9 = vmul.f32 %v688_v6, %v688_v6 }
 0x28b   :  { %v694_v10 = vsel %vm66_vm0, %v690_v9, 0.0 }
 0x28c   :  { %695 = vadd.xlane.f32.xlu1 %v694_v10 }
 0x311   :  { %v683_v11 = vpop.xlane.xlu0 %682 }
 0x315   :  { %v686_v12 = vpop.xlane.xlu1 %685  ;;  %v693_v14 = vpop.xlane.xlu0 %692 }
 0x316   :  { %v697_v16 = vadd.f32 %v693_v14, %v683_v11 }
 0x318   :  { %v700_v17 = vmul.f32 0.032258064, %v697_v16 }
 0x319   :  { %v696_v18 = vpop.xlane.xlu1 %695 }
 0x31a   :  { %v702_v20 = vadd.f32 1e-09, %v700_v17  ;;  %v698_v22 = vadd.f32 %v696_v18, %v686_v12 }
 0x31c   :  { %955 = vrsqrt.f32 %v702_v20  ;;  %v701_v23 = vmul.f32 0.032258064, %v698_v22 }
 0x31e   :  { %v703_v24 = vadd.f32 1e-09, %v701_v23 }
 0x320   :  { %957 = vrsqrt.f32 %v703_v24 }
 0x326   :  { %v956_v25 = vpop.eup %955 }
 0x327   :  { %v706_v29 = vmul.f32 %v956_v25, %v677_v60  ;;  %v708_v30 = vmul.f32 %v956_v25, %v687_v15 }
 0x329   :  { %v716_v31 = vmul.f32 %v784_v26, %v706_v29  ;;  %v724_v32 = vmul.f32 %v785_v28, %v708_v30  ;;  %v736_v33 = vmul.f32 %v785_v28, %v706_v29  ;;  %v744_v34 = vmul.f32 %v787_v27, %v708_v30 }
 0x32a   :  { %v958_v35 = vpop.eup %957 }
 0x32b   :  { %v726_v38 = vadd.f32 %v724_v32, %v716_v31  ;;  %v746_v39 = vadd.f32 %v744_v34, %v736_v33  ;;  %v707_v40 = vmul.f32 %v958_v35, %v678_v1  ;;  %v709_v41 = vmul.f32 %v958_v35, %v688_v6 }
 0x32d   :  { %v734_v42 = vadd.f32 %v786_v36, %v726_v38  ;;  %v754_v43 = vadd.f32 %v788_v37, %v746_v39  ;;  %v717_v44 = vmul.f32 %v784_v26, %v707_v40  ;;  %v725_v45 = vmul.f32 %v785_v28, %v709_v41 }
 0x32e   :  { %v737_v46 = vmul.f32 %v785_v28, %v707_v40  ;;  %v745_v48 = vmul.f32 %v787_v27, %v709_v41 }
 0x32f   :  { %756 = vst.msk [vmem:[%s1212_s15] sm:$0xff] %vm66_vm0, %v734_v42  ;;  %758 = vst.msk [vmem:[%s1213_s16] sm:$0xff] %vm66_vm0, %v754_v43  ;;  %v727_v49 = vadd.f32 %v725_v45, %v717_v44 }
 0x330   :  { %v747_v50 = vadd.f32 %v745_v48, %v737_v46 }
 0x331   :  { %v735_v51 = vadd.f32 %v786_v36, %v727_v49 }
 0x332   :  { %v755_v52 = vadd.f32 %v788_v37, %v747_v50 }
 0x333   :  { %757 = vst.msk [vmem:[%s1212_s15 + $0x8] sm:$0xff] %vm66_vm0, %v735_v51 }
 0x334   :  { %759 = vst.msk [vmem:[%s1213_s16 + $0x8] sm:$0xff] %vm66_vm0, %v755_v52 }

// kernel: complex_encoder_block.5
= control target key start
LH: loop header
LB: loop body
LE: loop exit
PB: predicated region body
PF: predicated region fallthrough
CT: control target
= control target key end

     0   :  { %s2639_s12 = smov 0   ;;  %s2873_s0 = inlined_call_operand.vmem [shape: f32[2,8,96], index: 0, kind: input, shape index: {}]   ;;  %s2874_s1 = inlined_call_operand.vmem [shape: f32[2,8,96], index: 1, kind: input, shape index: {}]   ;;  %s2875_s2 = inlined_call_operand.vmem [shape: f32[2,8,32], index: 2, kind: output, shape index: {0}]   ;;  %s2876_s3 = inlined_call_operand.vmem [shape: f32[2,8,32], index: 3, kind: output, shape index: {1}]  }
   0x1 LB: > { %s2332_s13 = sadd.s32 4294967295, %s2601_s12   ;;  %p2336_p0 = scmp.ge.s32.totalorder %s2601_s12, 1  ;;  %s2601_s12 = sphi %s2639_s12, %s14_s12  }
   0x2   : > { %p148_p1 = scmp.lt.s32.totalorder %s2601_s12, 3 }
   0x4   : > { %p149_p2 = pnand %p2336_p0, %p148_p1 }
   0x5   : > { %p178_p3 = scmp.lt.s32.totalorder (!%p149_p2), %s2332_s13, 1  ;;  %v2603_v0 = vmov (!%p149_p2), 0.0   ;;  %vm2604_vm0 = vmmov (!%p149_p2), 0   ;;  %s2605_s21 = smov (!%p149_p2), 96   ;;  %vm199_vm1 = vcmask (!%p149_p2), 64512   ;;  %vm1199_vm10 = vcmask (!%p149_p2), 130112  }
   0x6   : > { %152 = sbr.rel (%p149_p2) target bundleno = 2723 (0xaa3), region = 28  ;;  %2427 = vmatprep.subr.mxu0 (!%p149_p2), %v2603_v0  ;;  %2432 = vmatprep.subr.mxu1 (!%p149_p2), %v2603_v0  ;;  %s2606_s22 = smov (!%p149_p2), 64   ;;  %vm1713_vm11 = vcmask (!%p149_p2), 195712   ;;  %vm2227_vm12 = vcmask (!%p149_p2), 261312  }
   0x7   : > { %2429 = vmatprep.mubr.msk.f32.mxu0 (!%p149_p2), %vm2604_vm0, %v2603_v0  ;;  %2434 = vmatprep.mubr.msk.f32.mxu1 (!%p149_p2), %vm2604_vm0, %v2603_v0  ;;  %s2607_s23 = smov (!%p149_p2), 120   ;;  %s2608_s24 = smov (!%p149_p2), 88  }
   0x8   : > { %s2609_s25 = smov (!%p149_p2), 56   ;;  %s2610_s26 = smov (!%p149_p2), 80  }
   0x9   : > { %s2611_s6 = smov (!%p149_p2), 112   ;;  %s2612_s7 = smov (!%p149_p2), 48  }
   0xa   : > { %s2613_s8 = smov (!%p149_p2), 104   ;;  %s2614_s9 = smov (!%p149_p2), 72  }
   0xb   : > { %s2615_s10 = smov (!%p149_p2), 40   ;;  %s2616_s11 = smov (!%p149_p2), 8  }
   0xd   : > { %s2878_s13 = smov (!%p178_p3, %s2332_s13), 1 }
   0xe   : > { %s2653_s14 = sshll.u32 %s2878_s13, 3  ;;  %s2617_s13 = smov 16  }
   0xf   : > { %s185_s17 = scalar_lea.vmem %s2874_s1, %s2653_s14  ;;  %s181_s20 = scalar_lea.vmem %s2873_s0, %s2653_s14 }
  0x10   : > { %v2663_v1 = vld [vmem:[%s185_s17] sm:$0xff]  ;;  %s2742_s29 = scalar_lea.vmem %s2875_s2, %s2653_s14  ;;  %s2750_s5 = scalar_lea.vmem %s2876_s3, %s2653_s14 }
  0x11   : > { %v2665_v2 = vld [vmem:[%s181_s20] sm:$0xff]  ;;  %275 = vrot.lane.b32.xlu1 %v2663_v1, %s2605_s21  ;;  %s2618_s14 = smov 24  }
  0x12   : > { %197 = vrot.lane.b32.xlu0 %v2665_v2, %s2605_s21  ;;  %v2671_v3 = vsub.f32 %v2663_v1, %v2665_v2  ;;  %v2684_v7 = vadd.f32 %v2663_v1, %v2665_v2 }
  0x16   : > { %356 = vrot.lane.b32.xlu0 %v2671_v3, %s2605_s21 }
  0x1a   : > { %536 = vrot.lane.b32.xlu0 %v2663_v1, %s2606_s22 }
  0x83   : > { %v276_v4 = vpop.permute.xlu1 %275 }
  0x84   : > { %v198_v5 = vpop.permute.xlu0 %197  ;;  %2433 = vmatpush3.xpose.msk.msra.mxu1 %vm199_vm1, %v276_v4 }
  0x85   : > { %2428 = vmatpush3.xpose.msk.msra.mxu0 %vm199_vm1, %v198_v5  ;;  %2442 = vmatprep.subr.mxu1 %v2603_v0 }
  0x86   : > { %2437 = vmatprep.subr.mxu0 %v2603_v0 }
  0x87   : > { %2435 = vmatmul.mubr.msk.f32.vlgmr.msra.gmra.mrb[0].mxu1 %vm199_vm1, %v2663_v1 }
  0x88   : > { %2430 = vmatmul.mubr.msk.f32.vlgmr.msra.gmra.mrb[0].mxu0 %vm199_vm1, %v2665_v2  ;;  %v357_v6 = vpop.permute.xlu0 %356  ;;  %2444 = vmatprep.mubr.msk.f32.mxu1 %vm2604_vm0, %v2603_v0 }
  0x89   : > { %2438 = vmatpush3.xpose.msk.msra.mxu0 %vm199_vm1, %v357_v6  ;;  %2439 = vmatprep.mubr.msk.f32.mxu0 %vm2604_vm0, %v2603_v0 }
  0x8a   : > { %2447 = vmatprep.subr.mxu0 %v2603_v0 }
  0x8c   : > { %2440 = vmatmul.mubr.msk.f32.vlgmr.msra.gmra.mrb[2].mxu0 %vm199_vm1, %v2684_v7  ;;  %v537_v28 = vpop.permute.xlu0 %536 }
  0x8d   : > { %2449 = vmatprep.mubr.msk.f32.mxu0 %vm2604_vm0, %v2603_v0  ;;  %2448 = vmatpush3.msra.mxu0 %v537_v28 }
  0x8e   : > { %2457 = vmatprep.subr.mxu0 %v2603_v0 }
 0x15a   : > { %v347_v9 = vpop.f32.mrb[0].mxu1 }
 0x15b   : > { %v270_v8 = vpop.f32.mrb[0].mxu0  ;;  %v2436_v12 = vpop.f32.mrb[1].mxu1 }
 0x15c   : > { %v353_v10 = vadd.f32 %v347_v9, %v270_v8  ;;  %v2431_v11 = vpop.f32.mrb[1].mxu0 }
 0x15e   : > { %v354_v16 = vmul.f32 0.35355338, %v353_v10 }
 0x15f   : > { %v429_v13 = vpop.f32.mrb[2].mxu0 }
 0x160   : > { %v430_v14 = vadd.f32 %v429_v13, %v270_v8  ;;  %v2441_v15 = vpop.f32.mrb[3].mxu0  ;;  %v435_v19 = vmul.f32 %v354_v16, %v354_v16 }
 0x162   : > { %v433_v17 = vsub.f32 %v430_v14, %v347_v9 }
 0x164   : > { %v434_v18 = vmul.f32 0.35355338, %v433_v17 }
 0x166   : > { %v436_v20 = vmul.f32 %v434_v18, %v434_v18 }
 0x168   : > { %v437_v21 = vadd.f32 %v436_v20, %v435_v19 }
 0x16a   : > { %2571 = vrsqrt.f32 %v437_v21  ;;  %vm440_vm2 = vcmp.eq.f32.partialorder %v437_v21, inf  ;;  %v443_v24 = vand.u32 2147483648, %v437_v21  ;;  %vm442_vm3 = vcmp.eq.f32.partialorder %v437_v21, 0.0 }
 0x174   : > { %v2572_v22 = vpop.eup %2571 }
 0x175   : > { %v439_v23 = vmul.f32 %v2572_v22, %v437_v21 }
 0x177   : > { %v441_v25 = vsel %vm440_vm2, %v437_v21, %v439_v23 }
 0x178   : > { %v444_v26 = vsel %vm442_vm3, %v443_v24, %v441_v25 }
 0x179   : > { %v445_v27 = vsel %vm199_vm1, %v444_v26, -inf  ;;  %v454_v35 = vadd.f32 1e-09, %v444_v26 }
 0x17a   : > { %446 = vmax.xlane.f32.xlu1 %v445_v27 }
 0x18b   : > { %460 = vrot.lane.b32.xlu1 %v2665_v2, %s2606_s22 }
 0x18f   : > { %613 = vrot.lane.b32.xlu1 %v2684_v7, %s2606_s22 }
 0x193   : > { %697 = vrot.lane.b32.xlu1 %v2665_v2, %s2607_s23 }
 0x197   : > { %778 = vrot.lane.b32.xlu1 %v2663_v1, %s2608_s24 }
 0x19b   : > { %776 = vrot.lane.b32.xlu1 %v2663_v1, %s2607_s23 }
 0x19f   : > { %965 = vrot.lane.b32.xlu1 %v2665_v2, %s2609_s25 }
 0x1a3   : > { %1213 = vrot.lane.b32.xlu1 %v2665_v2, %s2610_s26 }
 0x207   : > { %v447_v29 = vpop.xlane.xlu1 %446 }
 0x208   : > { %v448_v30 = vsub.f32 %v444_v26, %v447_v29 }
 0x20a   : > { %v449_v31 = vmul.f32 1.442695, %v448_v30 }
 0x20b   : > { %v461_v34 = vpop.permute.xlu1 %460 }
 0x20c   : > { %2573 = vpow2.f32 %v449_v31  ;;  %2443 = vmatpush3.msra.mxu1 %v461_v34 }
 0x20d   : > { %2452 = vmatprep.subr.mxu1 %v2603_v0 }
 0x20f   : > { %v614_v38 = vpop.permute.xlu1 %613 }
 0x213   : > { %v698_v42 = vpop.permute.xlu1 %697 }
 0x216   : > { %v2574_v32 = vpop.eup %2573 }
 0x217   : > { %v451_v33 = vsel %vm199_vm1, %v2574_v32, 0.0  ;;  %v779_v47 = vpop.permute.xlu1 %778 }
 0x218   : > { %452 = vadd.xlane.f32.xlu0 %v451_v33 }
 0x21b   : > { %v777_v49 = vpop.permute.xlu1 %776 }
 0x21f   : > { %v966_v20 = vpop.permute.xlu1 %965 }
 0x223   : > { %v1214_v27 = vpop.permute.xlu1 %1213 }
 0x22e   : > { %699 = vrot.lane.b32.xlu0 %v2665_v2, %s2608_s24 }
 0x232   : > { %862 = vrot.lane.b32.xlu0 %v2671_v3, %s2608_s24 }
 0x236   : > { %859 = vrot.lane.b32.xlu0 %v2684_v7, %s2607_s23 }
 0x2a5   : > { %v453_v36 = vpop.xlane.xlu0 %452 }
 0x2a6   : > { %v455_v37 = vmul.f32 %v454_v35, %v453_v36 }
 0x2a8   : > { %2575 = vrcp.f32 %v455_v37 }
 0x2a9   : > { %v700_v39 = vpop.permute.xlu0 %699 }
 0x2ad   : > { %v863_v45 = vpop.permute.xlu0 %862 }
 0x2b1   : > { %v860_v48 = vpop.permute.xlu0 %859 }
 0x2b2   : > { %v2576_v40 = vpop.eup %2575 }
 0x2b3   : > { %v457_v41 = vmul.f32 %v2576_v40, %v2574_v32 }
 0x2b5   : > { %v458_v43 = vmul.f32 %v457_v41, %v354_v16  ;;  %v459_v44 = vmul.f32 %v457_v41, %v434_v18 }
 0x2b7   : > { %2445 = vmatmul.mubr.msk.f32.vlgmr.msra.gmra.mrb[2].mxu1 %vm199_vm1, %v458_v43  ;;  %2450 = vmatmul.mubr.msk.f32.vlgmr.msra.gmra.mrb[4].mxu0 %vm199_vm1, %v459_v44  ;;  %v612_v46 = vadd.f32 %v459_v44, %v458_v43 }
 0x2b8   : > { %2453 = vmatpush3.msra.mxu1 %v614_v38  ;;  %2458 = vmatpush3.xpose.msk.msra.mxu0 %vm199_vm1, %v700_v39 }
 0x2b9   : > { %2459 = vmatprep.mubr.msk.f32.mxu0 %vm2604_vm0, %v2603_v0  ;;  %2467 = vmatprep.subr.mxu0 %v2603_v0 }
 0x2ba   : > { %2454 = vmatprep.mubr.msk.f32.mxu1 %vm2604_vm0, %v2603_v0  ;;  %2462 = vmatprep.subr.mxu1 %v2603_v0 }
 0x2bb   : > { %2455 = vmatmul.mubr.msk.f32.vlgmr.msra.gmra.mrb[4].mxu1 %vm199_vm1, %v612_v46  ;;  %2460 = vmatmul.mubr.msk.f32.vlgmr.msra.gmra.mrb[6].mxu0 %vm199_vm1, %v698_v42 }
 0x2bc   : > { %2468 = vmatpush3.xpose.msk.msra.mxu0 %vm199_vm1, %v863_v45  ;;  %2469 = vmatprep.mubr.msk.f32.mxu0 %vm2604_vm0, %v2603_v0 }
 0x2bd   : > { %2464 = vmatprep.mubr.msk.f32.mxu1 %vm2604_vm0, %v2603_v0  ;;  %2477 = vmatprep.subr.mxu0 %v2603_v0 }
 0x2bf   : > { %2463 = vmatpush3.xpose.msk.msra.mxu1 %vm199_vm1, %v779_v47  ;;  %2470 = vmatmul.mubr.msk.f32.vlgmr.msra.gmra.mrb[8].mxu0 %vm199_vm1, %v860_v48 }
 0x2c0   : > { %2472 = vmatprep.subr.mxu1 %v2603_v0  ;;  %2479 = vmatprep.mubr.msk.f32.mxu0 %vm2604_vm0, %v2603_v0 }
 0x2c2   : > { %2465 = vmatmul.mubr.msk.f32.vlgmr.msra.gmra.mrb[6].mxu1 %vm199_vm1, %v777_v49 }
 0x2c3   : > { %2474 = vmatprep.mubr.msk.f32.mxu1 %vm2604_vm0, %v2603_v0  ;;  %2473 = vmatpush3.msra.mxu1 %v966_v20 }
 0x2c4   : > { %2482 = vmatprep.subr.mxu1 %v2603_v0 }
 0x38a   : > { %v532_v50 = vpop.f32.mrb[2].mxu1  ;;  %v608_v51 = vpop.f32.mrb[4].mxu0 }
 0x38b   : > { %v689_v52 = vsub.f32 %v532_v50, %v608_v51  ;;  %v2446_v53 = vpop.f32.mrb[3].mxu1  ;;  %v2451_v54 = vpop.f32.mrb[5].mxu0 }
 0x38d   : > { %690 = vst.msk [vmem:[%s2742_s29] sm:$0xff] %vm199_vm1, %v689_v52 }
 0x38e   : > { %v685_v55 = vpop.f32.mrb[4].mxu1  ;;  %v771_v56 = vpop.f32.mrb[6].mxu0 }
 0x38f   : > { %v691_v57 = vsub.f32 %v685_v55, %v532_v50  ;;  %v2456_v58 = vpop.f32.mrb[5].mxu1  ;;  %v2461_v59 = vpop.f32.mrb[7].mxu0 }
 0x391   : > { %v692_v60 = vsub.f32 %v691_v57, %v608_v51 }
 0x392   : > { %v934_v61 = vpop.f32.mrb[8].mxu0 }
 0x393   : > { %693 = vst.msk [vmem:[%s2750_s5] sm:$0xff] %vm199_vm1, %v692_v60  ;;  %v935_v62 = vadd.f32 %v934_v61, %v771_v56  ;;  %v2471_v63 = vpop.f32.mrb[9].mxu0 }
 0x395   : > { %v850_v4 = vpop.f32.mrb[6].mxu1 }
 0x396   : > { %v856_v5 = vadd.f32 %v850_v4, %v771_v56  ;;  %v938_v6 = vsub.f32 %v935_v62, %v850_v4  ;;  %v2466_v8 = vpop.f32.mrb[7].mxu1 }
 0x398   : > { %v857_v9 = vmul.f32 0.35355338, %v856_v5  ;;  %v939_v10 = vmul.f32 0.35355338, %v938_v6 }
 0x39a   : > { %v940_v11 = vmul.f32 %v857_v9, %v857_v9  ;;  %v941_v12 = vmul.f32 %v939_v10, %v939_v10 }
 0x39c   : > { %v942_v13 = vadd.f32 %v941_v12, %v940_v11 }
 0x39e   : > { %2577 = vrsqrt.f32 %v942_v13  ;;  %vm945_vm4 = vcmp.eq.f32.partialorder %v942_v13, inf  ;;  %v948_v16 = vand.u32 2147483648, %v942_v13  ;;  %vm947_vm5 = vcmp.eq.f32.partialorder %v942_v13, 0.0 }
 0x3a8   : > { %v2578_v14 = vpop.eup %2577 }
 0x3a9   : > { %v944_v15 = vmul.f32 %v2578_v14, %v942_v13 }
 0x3ab   : > { %v946_v17 = vsel %vm945_vm4, %v942_v13, %v944_v15 }
 0x3ac   : > { %v949_v18 = vsel %vm947_vm5, %v948_v16, %v946_v17 }
 0x3ad   : > { %v950_v19 = vsel %vm199_vm1, %v949_v18, -inf  ;;  %v959_v28 = vadd.f32 1e-09, %v949_v18 }
 0x3ae   : > { %951 = vmax.xlane.f32.xlu0 %v950_v19 }
 0x3c4   : > { %1041 = vrot.lane.b32.xlu0 %v2663_v1, %s2609_s25 }
 0x3c8   : > { %1118 = vrot.lane.b32.xlu0 %v2684_v7, %s2609_s25 }
 0x3cc   : > { %1211 = vrot.lane.b32.xlu0 %v2665_v2, %s2611_s6 }
 0x3d0   : > { %1292 = vrot.lane.b32.xlu0 %v2663_v1, %s2610_s26 }
 0x3d4   : > { %1290 = vrot.lane.b32.xlu0 %v2663_v1, %s2611_s6 }
 0x3d8   : > { %1555 = vrot.lane.b32.xlu0 %v2663_v1, %s2612_s7 }
 0x43b   : > { %v952_v21 = vpop.xlane.xlu0 %951 }
 0x43c   : > { %v953_v22 = vsub.f32 %v949_v18, %v952_v21 }
 0x43e   : > { %v954_v23 = vmul.f32 1.442695, %v953_v22 }
 0x43f   : > { %v1042_v26 = vpop.permute.xlu0 %1041 }
 0x440   : > { %2579 = vpow2.f32 %v954_v23  ;;  %2478 = vmatpush3.msra.mxu0 %v1042_v26 }
 0x441   : > { %2487 = vmatprep.subr.mxu0 %v2603_v0 }
 0x443   : > { %v1119_v31 = vpop.permute.xlu0 %1118 }
 0x447   : > { %v1212_v34 = vpop.permute.xlu0 %1211 }
 0x44a   : > { %v2580_v24 = vpop.eup %2579 }
 0x44b   : > { %v956_v25 = vsel %vm199_vm1, %v2580_v24, 0.0  ;;  %v1293_v39 = vpop.permute.xlu0 %1292 }
 0x44c   : > { %957 = vadd.xlane.f32.xlu1 %v956_v25 }
 0x44f   : > { %v1291_v41 = vpop.permute.xlu0 %1290 }
 0x453   : > { %v1556_v12 = vpop.permute.xlu0 %1555 }
 0x45d   : > { %1376 = vrot.lane.b32.xlu1 %v2671_v3, %s2610_s26 }
 0x461   : > { %1373 = vrot.lane.b32.xlu1 %v2684_v7, %s2611_s6 }
 0x4d9   : > { %v958_v29 = vpop.xlane.xlu1 %957 }
 0x4da   : > { %v960_v30 = vmul.f32 %v959_v28, %v958_v29 }
 0x4dc   : > { %2581 = vrcp.f32 %v960_v30 }
 0x4dd   : > { %v1377_v37 = vpop.permute.xlu1 %1376 }
 0x4e1   : > { %v1374_v40 = vpop.permute.xlu1 %1373 }
 0x4e6   : > { %v2582_v32 = vpop.eup %2581 }
 0x4e7   : > { %v962_v33 = vmul.f32 %v2582_v32, %v2580_v24 }
 0x4e9   : > { %v963_v35 = vmul.f32 %v962_v33, %v857_v9  ;;  %v964_v36 = vmul.f32 %v962_v33, %v939_v10 }
 0x4eb   : > { %2475 = vmatmul.mubr.msk.f32.vlgmr.msra.gmra.mrb[8].mxu1 %vm199_vm1, %v963_v35  ;;  %2480 = vmatmul.mubr.msk.f32.vlgmr.msra.gmra.mrb[10].mxu0 %vm199_vm1, %v964_v36  ;;  %v1117_v38 = vadd.f32 %v964_v36, %v963_v35 }
 0x4ec   : > { %2483 = vmatpush3.msra.mxu1 %v1119_v31  ;;  %2488 = vmatpush3.xpose.msk.msra.mxu0 %vm199_vm1, %v1214_v27 }
 0x4ed   : > { %2484 = vmatprep.mubr.msk.f32.mxu1 %vm2604_vm0, %v2603_v0  ;;  %2489 = vmatprep.mubr.msk.f32.mxu0 %vm2604_vm0, %v2603_v0 }
 0x4ee   : > { %2497 = vmatprep.subr.mxu0 %v2603_v0  ;;  %2492 = vmatprep.subr.mxu1 %v2603_v0 }
 0x4ef   : > { %2485 = vmatmul.mubr.msk.f32.vlgmr.msra.gmra.mrb[10].mxu1 %vm199_vm1, %v1117_v38  ;;  %2490 = vmatmul.mubr.msk.f32.vlgmr.msra.gmra.mrb[12].mxu0 %vm199_vm1, %v1212_v34 }
 0x4f0   : > { %2498 = vmatpush3.xpose.msk.msra.mxu0 %vm199_vm1, %v1377_v37  ;;  %2499 = vmatprep.mubr.msk.f32.mxu0 %vm2604_vm0, %v2603_v0 }
 0x4f1   : > { %2494 = vmatprep.mubr.msk.f32.mxu1 %vm2604_vm0, %v2603_v0  ;;  %2507 = vmatprep.subr.mxu0 %v2603_v0 }
 0x4f3   : > { %2493 = vmatpush3.xpose.msk.msra.mxu1 %vm199_vm1, %v1293_v39  ;;  %2500 = vmatmul.mubr.msk.f32.vlgmr.msra.gmra.mrb[14].mxu0 %vm199_vm1, %v1374_v40 }
 0x4f4   : > { %2502 = vmatprep.subr.mxu1 %v2603_v0  ;;  %2509 = vmatprep.mubr.msk.f32.mxu0 %vm2604_vm0, %v2603_v0 }
 0x4f5   : > { %2508 = vmatpush3.msra.mxu0 %v1556_v12 }
 0x4f6   : > { %2495 = vmatmul.mubr.msk.f32.vlgmr.msra.gmra.mrb[12].mxu1 %vm199_vm1, %v1291_v41  ;;  %2517 = vmatprep.subr.mxu0 %v2603_v0 }
 0x4f7   : > { %2504 = vmatprep.mubr.msk.f32.mxu1 %vm2604_vm0, %v2603_v0 }
 0x5be   : > { %v2796_v42 = vpop.f32.mrb[8].mxu1  ;;  %v2798_v43 = vpop.f32.mrb[10].mxu0 }
 0x5bf   : > { %v1194_v44 = vsub.f32 %v2796_v42, %v2798_v43  ;;  %v2476_v45 = vpop.f32.mrb[9].mxu1  ;;  %v2481_v46 = vpop.f32.mrb[11].mxu0 }
 0x5c2   : > { %v1190_v47 = vpop.f32.mrb[10].mxu1  ;;  %v1285_v48 = vpop.f32.mrb[12].mxu0 }
 0x5c3   : > { %v1201_v49 = vsub.f32 %v1190_v47, %v2796_v42  ;;  %v2486_v50 = vpop.f32.mrb[11].mxu1  ;;  %v2491_v51 = vpop.f32.mrb[13].mxu0 }
 0x5c5   : > { %v2804_v52 = vsub.f32 %v1201_v49, %v2798_v43 }
 0x5c6   : > { %v1448_v53 = vpop.f32.mrb[14].mxu0 }
 0x5c7   : > { %v1449_v54 = vadd.f32 %v1448_v53, %v1285_v48  ;;  %v2501_v55 = vpop.f32.mrb[15].mxu0 }
 0x5c9   : > { %v1364_v56 = vpop.f32.mrb[12].mxu1 }
 0x5ca   : > { %v1370_v57 = vadd.f32 %v1364_v56, %v1285_v48  ;;  %v1452_v58 = vsub.f32 %v1449_v54, %v1364_v56  ;;  %v2496_v59 = vpop.f32.mrb[13].mxu1 }
 0x5cc   : > { %v1371_v60 = vmul.f32 0.35355338, %v1370_v57  ;;  %v1453_v61 = vmul.f32 0.35355338, %v1452_v58 }
 0x5ce   : > { %v1454_v62 = vmul.f32 %v1371_v60, %v1371_v60  ;;  %v1455_v63 = vmul.f32 %v1453_v61, %v1453_v61 }
 0x5d0   : > { %v1456_v4 = vadd.f32 %v1455_v63, %v1454_v62 }
 0x5d2   : > { %2583 = vrsqrt.f32 %v1456_v4  ;;  %vm1459_vm6 = vcmp.eq.f32.partialorder %v1456_v4, inf  ;;  %v1462_v8 = vand.u32 2147483648, %v1456_v4  ;;  %vm1461_vm7 = vcmp.eq.f32.partialorder %v1456_v4, 0.0 }
 0x5dc   : > { %v2584_v5 = vpop.eup %2583 }
 0x5dd   : > { %v1458_v6 = vmul.f32 %v2584_v5, %v1456_v4 }
 0x5df   : > { %v1460_v9 = vsel %vm1459_vm6, %v1456_v4, %v1458_v6 }
 0x5e0   : > { %v1463_v10 = vsel %vm1461_vm7, %v1462_v8, %v1460_v9 }
 0x5e1   : > { %v1464_v11 = vsel %vm199_vm1, %v1463_v10, -inf  ;;  %v1473_v19 = vadd.f32 1e-09, %v1463_v10 }
 0x5e2   : > { %1465 = vmax.xlane.f32.xlu1 %v1464_v11 }
 0x5f3   : > { %1479 = vrot.lane.b32.xlu1 %v2665_v2, %s2612_s7 }
 0x5f7   : > { %1632 = vrot.lane.b32.xlu1 %v2684_v7, %s2612_s7 }
 0x5fb   : > { %1725 = vrot.lane.b32.xlu1 %v2665_v2, %s2613_s8 }
 0x5ff   : > { %1806 = vrot.lane.b32.xlu1 %v2663_v1, %s2614_s9 }
 0x603   : > { %1804 = vrot.lane.b32.xlu1 %v2663_v1, %s2613_s8 }
 0x66f   : > { %v1466_v13 = vpop.xlane.xlu1 %1465 }
 0x670   : > { %v1467_v14 = vsub.f32 %v1463_v10, %v1466_v13 }
 0x672   : > { %v1468_v15 = vmul.f32 1.442695, %v1467_v14 }
 0x673   : > { %v1480_v18 = vpop.permute.xlu1 %1479 }
 0x674   : > { %2585 = vpow2.f32 %v1468_v15  ;;  %2503 = vmatpush3.msra.mxu1 %v1480_v18 }
 0x675   : > { %2512 = vmatprep.subr.mxu1 %v2603_v0 }
 0x677   : > { %v1633_v22 = vpop.permute.xlu1 %1632 }
 0x67b   : > { %v1726_v26 = vpop.permute.xlu1 %1725 }
 0x67e   : > { %v2586_v16 = vpop.eup %2585 }
 0x67f   : > { %v1470_v17 = vsel %vm199_vm1, %v2586_v16, 0.0  ;;  %v1807_v30 = vpop.permute.xlu1 %1806 }
 0x680   : > { %1471 = vadd.xlane.f32.xlu0 %v1470_v17 }
 0x683   : > { %v1805_v32 = vpop.permute.xlu1 %1804 }
 0x696   : > { %1727 = vrot.lane.b32.xlu0 %v2665_v2, %s2614_s9 }
 0x69a   : > { %1890 = vrot.lane.b32.xlu0 %v2671_v3, %s2614_s9 }
 0x69e   : > { %1887 = vrot.lane.b32.xlu0 %v2684_v7, %s2613_s8 }
 0x70d   : > { %v1472_v20 = vpop.xlane.xlu0 %1471 }
 0x70e   : > { %v1474_v21 = vmul.f32 %v1473_v19, %v1472_v20 }
 0x710   : > { %2587 = vrcp.f32 %v1474_v21 }
 0x711   : > { %v1728_v23 = vpop.permute.xlu0 %1727 }
 0x715   : > { %v1891_v29 = vpop.permute.xlu0 %1890 }
 0x719   : > { %v1888_v31 = vpop.permute.xlu0 %1887 }
 0x71a   : > { %v2588_v24 = vpop.eup %2587 }
 0x71b   : > { %v1476_v25 = vmul.f32 %v2588_v24, %v2586_v16 }
 0x71d   : > { %v1477_v27 = vmul.f32 %v1476_v25, %v1371_v60  ;;  %v1478_v28 = vmul.f32 %v1476_v25, %v1453_v61 }
 0x71f   : > { %2505 = vmatmul.mubr.msk.f32.vlgmr.msra.gmra.mrb[14].mxu1 %vm199_vm1, %v1477_v27  ;;  %2510 = vmatmul.mubr.msk.f32.vlgmr.msra.gmra.mrb[16].mxu0 %vm199_vm1, %v1478_v28  ;;  %v1631_v3 = vadd.f32 %v1478_v28, %v1477_v27 }
 0x720   : > { %2513 = vmatpush3.msra.mxu1 %v1633_v22  ;;  %2518 = vmatpush3.xpose.msk.msra.mxu0 %vm199_vm1, %v1728_v23 }
 0x721   : > { %2519 = vmatprep.mubr.msk.f32.mxu0 %vm2604_vm0, %v2603_v0  ;;  %2514 = vmatprep.mubr.msk.f32.mxu1 %vm2604_vm0, %v2603_v0 }
 0x722   : > { %2527 = vmatprep.subr.mxu0 %v2603_v0  ;;  %2522 = vmatprep.subr.mxu1 %v2603_v0 }
 0x723   : > { %2515 = vmatmul.mubr.msk.f32.vlgmr.msra.gmra.mrb[16].mxu1 %vm199_vm1, %v1631_v3  ;;  %2520 = vmatmul.mubr.msk.f32.vlgmr.msra.gmra.mrb[18].mxu0 %vm199_vm1, %v1726_v26 }
 0x724   : > { %2528 = vmatpush3.xpose.msk.msra.mxu0 %vm199_vm1, %v1891_v29  ;;  %2529 = vmatprep.mubr.msk.f32.mxu0 %vm2604_vm0, %v2603_v0 }
 0x725   : > { %2524 = vmatprep.mubr.msk.f32.mxu1 %vm2604_vm0, %v2603_v0  ;;  %2537 = vmatprep.subr.mxu0 %v2603_v0 }
 0x727   : > { %2523 = vmatpush3.xpose.msk.msra.mxu1 %vm199_vm1, %v1807_v30  ;;  %2530 = vmatmul.mubr.msk.f32.vlgmr.msra.gmra.mrb[20].mxu0 %vm199_vm1, %v1888_v31 }
 0x728   : > { %2532 = vmatprep.subr.mxu1 %v2603_v0  ;;  %2539 = vmatprep.mubr.msk.f32.mxu0 %vm2604_vm0, %v2603_v0 }
 0x72a   : > { %2525 = vmatmul.mubr.msk.f32.vlgmr.msra.gmra.mrb[18].mxu1 %vm199_vm1, %v1805_v32 }
 0x72b   : > { %2534 = vmatprep.mubr.msk.f32.mxu1 %vm2604_vm0, %v2603_v0 }
 0x7f2   : > { %v1551_v33 = vpop.f32.mrb[14].mxu1  ;;  %v1627_v34 = vpop.f32.mrb[16].mxu0 }
 0x7f3   : > { %v1708_v35 = vsub.f32 %v1551_v33, %v1627_v34  ;;  %v2506_v36 = vpop.f32.mrb[15].mxu1  ;;  %v2511_v37 = vpop.f32.mrb[17].mxu0 }
 0x7f6   : > { %v1704_v38 = vpop.f32.mrb[16].mxu1  ;;  %v1799_v39 = vpop.f32.mrb[18].mxu0 }
 0x7f7   : > { %v1715_v40 = vsub.f32 %v1704_v38, %v1551_v33  ;;  %v2516_v41 = vpop.f32.mrb[17].mxu1  ;;  %v2521_v45 = vpop.f32.mrb[19].mxu0 }
 0x7f9   : > { %v1716_v46 = vsub.f32 %v1715_v40, %v1627_v34 }
 0x7fa   : > { %v1962_v47 = vpop.f32.mrb[20].mxu0 }
 0x7fb   : > { %v1963_v48 = vadd.f32 %v1962_v47, %v1799_v39  ;;  %v2531_v49 = vpop.f32.mrb[21].mxu0 }
 0x7fd   : > { %v1878_v50 = vpop.f32.mrb[18].mxu1 }
 0x7fe   : > { %v1884_v51 = vadd.f32 %v1878_v50, %v1799_v39  ;;  %v1966_v53 = vsub.f32 %v1963_v48, %v1878_v50  ;;  %v2526_v54 = vpop.f32.mrb[19].mxu1 }
 0x800   : > { %v1885_v55 = vmul.f32 0.35355338, %v1884_v51  ;;  %v1967_v56 = vmul.f32 0.35355338, %v1966_v53 }
 0x802   : > { %v1968_v57 = vmul.f32 %v1885_v55, %v1885_v55  ;;  %v1969_v58 = vmul.f32 %v1967_v56, %v1967_v56 }
 0x804   : > { %v1970_v59 = vadd.f32 %v1969_v58, %v1968_v57 }
 0x806   : > { %2589 = vrsqrt.f32 %v1970_v59  ;;  %vm1973_vm8 = vcmp.eq.f32.partialorder %v1970_v59, inf  ;;  %v1976_v62 = vand.u32 2147483648, %v1970_v59  ;;  %vm1975_vm9 = vcmp.eq.f32.partialorder %v1970_v59, 0.0 }
 0x810   : > { %v2590_v60 = vpop.eup %2589 }
 0x811   : > { %v1972_v61 = vmul.f32 %v2590_v60, %v1970_v59 }
 0x813   : > { %v1974_v63 = vsel %vm1973_vm8, %v1970_v59, %v1972_v61 }
 0x814   : > { %v1977_v4 = vsel %vm1975_vm9, %v1976_v62, %v1974_v63 }
 0x815   : > { %v1978_v5 = vsel %vm199_vm1, %v1977_v4, -inf  ;;  %v1987_v13 = vadd.f32 1e-09, %v1977_v4 }
 0x816   : > { %1979 = vmax.xlane.f32.xlu0 %v1978_v5 }
 0x82c   : > { %1993 = vrot.lane.b32.xlu0 %v2665_v2, %s2615_s10 }
 0x830   : > { %2069 = vrot.lane.b32.xlu0 %v2663_v1, %s2615_s10 }
 0x834   : > { %1204 = vrot.lane.b32.xlu0 %v2804_v52, %s2616_s11 }
 0x838   : > { %1718 = vrot.lane.b32.xlu0 %v1716_v46, %s2617_s13 }
 0x8a3   : > { %v1980_v6 = vpop.xlane.xlu0 %1979 }
 0x8a4   : > { %v1981_v8 = vsub.f32 %v1977_v4, %v1980_v6 }
 0x8a6   : > { %v1982_v9 = vmul.f32 1.442695, %v1981_v8 }
 0x8a7   : > { %v1994_v10 = vpop.permute.xlu0 %1993 }
 0x8a8   : > { %2591 = vpow2.f32 %v1982_v9  ;;  %2533 = vmatpush3.msra.mxu1 %v1994_v10 }
 0x8a9   : > { %2542 = vmatprep.subr.mxu1 %v2603_v0 }
 0x8ab   : > { %v2070_v11 = vpop.permute.xlu0 %2069 }
 0x8ac   : > { %2538 = vmatpush3.msra.mxu0 %v2070_v11 }
 0x8af   : > { %v1205_v2 = vpop.permute.xlu0 %1204 }
 0x8b0   : > { %1207 = vst.msk [vmem:[%s2750_s5] sm:$0xff] %vm1199_vm10, %v1205_v2 }
 0x8b2   : > { %v2592_v1 = vpop.eup %2591 }
 0x8b3   : > { %v1719_v52 = vpop.permute.xlu0 %1718  ;;  %v1984_v12 = vsel %vm199_vm1, %v2592_v1, 0.0 }
 0x8b4   : > { %1721 = vst.msk [vmem:[%s2750_s5] sm:$0xff] %vm1713_vm11, %v1719_v52  ;;  %1985 = vadd.xlane.f32.xlu1 %v1984_v12 }
 0x8c5   : > { %2146 = vrot.lane.b32.xlu1 %v2684_v7, %s2615_s10 }
 0x8c9   : > { %1196 = vrot.lane.b32.xlu1 %v1194_v44, %s2616_s11 }
 0x8cd   : > { %1710 = vrot.lane.b32.xlu1 %v1708_v35, %s2617_s13 }
 0x941   : > { %v1986_v14 = vpop.xlane.xlu1 %1985 }
 0x942   : > { %v1988_v15 = vmul.f32 %v1987_v13, %v1986_v14 }
 0x944   : > { %2593 = vrcp.f32 %v1988_v15 }
 0x945   : > { %v2147_v16 = vpop.permute.xlu1 %2146 }
 0x949   : > { %v1197_v17 = vpop.permute.xlu1 %1196 }
 0x94a   : > { %1200 = vst.msk [vmem:[%s2742_s29] sm:$0xff] %vm1199_vm10, %v1197_v17 }
 0x94d   : > { %v1711_v18 = vpop.permute.xlu1 %1710 }
 0x94e   : > { %v2594_v19 = vpop.eup %2593  ;;  %1714 = vst.msk [vmem:[%s2742_s29] sm:$0xff] %vm1713_vm11, %v1711_v18 }
 0x94f   : > { %v1990_v20 = vmul.f32 %v2594_v19, %v2592_v1 }
 0x951   : > { %v1991_v21 = vmul.f32 %v1990_v20, %v1885_v55  ;;  %v1992_v7 = vmul.f32 %v1990_v20, %v1967_v56 }
 0x953   : > { %2535 = vmatmul.mubr.msk.f32.vlgmr.msra.gmra.mrb[20].mxu1 %vm199_vm1, %v1991_v21  ;;  %2540 = vmatmul.mubr.msk.f32.vlgmr.msra.gmra.mrb[22].mxu0 %vm199_vm1, %v1992_v7  ;;  %v2145_v42 = vadd.f32 %v1992_v7, %v1991_v21 }
 0x954   : > { %2543 = vmatpush3.msra.mxu1 %v2147_v16  ;;  %2544 = vmatprep.mubr.msk.f32.mxu1 %vm2604_vm0, %v2603_v0 }
 0x957   : > { %2545 = vmatmul.mubr.msk.f32.vlgmr.msra.gmra.mrb[22].mxu1 %vm199_vm1, %v2145_v42 }
 0xa26   : > { %v2065_v43 = vpop.f32.mrb[20].mxu1  ;;  %v2141_v44 = vpop.f32.mrb[22].mxu0 }
 0xa27   : > { %v2222_v22 = vsub.f32 %v2065_v43, %v2141_v44  ;;  %v2536_v23 = vpop.f32.mrb[21].mxu1  ;;  %v2541_v24 = vpop.f32.mrb[23].mxu0 }
 0xa29   : > { %2224 = vrot.lane.b32.xlu1 %v2222_v22, %s2618_s14 }
 0xa2a   : > { %v2218_v25 = vpop.f32.mrb[22].mxu1 }
 0xa2b   : > { %v2229_v26 = vsub.f32 %v2218_v25, %v2065_v43  ;;  %v2546_v27 = vpop.f32.mrb[23].mxu1 }
 0xa2d   : > { %v2230_v28 = vsub.f32 %v2229_v26, %v2141_v44 }
 0xa2f   : > { %2232 = vrot.lane.b32.xlu0 %v2230_v28, %s2618_s14 }
 0xa9b   : > { %v2225_v29 = vpop.permute.xlu1 %2224 }
 0xa9c   : > { %2228 = vst.msk [vmem:[%s2742_s29] sm:$0xff] %vm2227_vm12, %v2225_v29 }
 0xaa1   : > { %v2233_v0 = vpop.permute.xlu0 %2232 }
 0xaa2   : > { %2235 = vst.msk [vmem:[%s2750_s5] sm:$0xff] %vm2227_vm12, %v2233_v0 }
 0xaa3 PF: > { %s14_s12 = sadd.s32 1, %s2601_s12  }
 0xaa4   : > { %p11_p4 = scmp.ge.s32.totalorder %s14_s12, 4  }
 0xaa6   :  { %13 = sbr.rel (!%p11_p4) target bundleno = 1 (0x1), region = 73 }

</bundles_post_ra>
